<compile_context>
chip_gen: v5e
topology: v5e:2x2
jax: 0.10.0
libtpu: 0.0.40
codegen_flags: <defaults>
</compile_context>

<pallas_src>
import numpy as np
import jax
import jax.numpy as jnp
from jax import lax
from jax.experimental import pallas as pl
from jax.experimental.pallas import tpu as pltpu

Z_DIM = 32
NEF = 2

LAYER_CFG = [
    # (Ci,      Co,      K, stride, pad, act)
    (Z_DIM,    NEF * 8, 1, 2, 0, "relu"),
    (NEF * 8,  NEF * 4, 4, 2, 1, "relu"),
    (NEF * 4,  NEF * 2, 4, 2, 0, "relu"),
    (NEF * 2,  NEF,     4, 2, 0, "relu"),
    (NEF,      1,       4, 2, 1, "sigmoid"),
]
N_LAYERS = len(LAYER_CFG)


def _out_hw(h, w, k, s, p):
    # PyTorch ConvTranspose2d output size (dilation=1, output_padding=0)
    return (h - 1) * s - 2 * p + k, (w - 1) * s - 2 * p + k


def _layer_dims():
    dims = []
    h = w = 1
    for (ci, co, k, s, p, _) in LAYER_CFG:
        oh, ow = _out_hw(h, w, k, s, p)
        dims.append((ci * h * w, co * oh * ow, h, w, oh, ow))
        h, w = oh, ow
    return dims


LAYER_DIMS = _layer_dims()
K_DIMS = [d[0] for d in LAYER_DIMS]                       # [32, 16, 32, 144, 392]
N_DIMS = [d[1] for d in LAYER_DIMS]                       # [16, 32, 144, 392, 784]
ROW_OFFSETS = [int(v) for v in np.cumsum([0] + K_DIMS[:-1])]   # [0, 32, 48, 80, 224]
SLAB_ROWS = int(sum(K_DIMS))                              # 616 (multiple of 8)
SLAB_COLS = int(-(-max(N_DIMS) // 128) * 128)             # 896 (lane-dense)
FINAL_N = N_DIMS[-1]                                      # 784


def init_params(key):
    """Deterministic in-script init; shapes match the PyTorch module."""
    params = []
    for (ci, co, k, _, _, _) in LAYER_CFG:
        key, k1, k2 = jax.random.split(key, 3)
        bound = 1.0 / (ci * k * k) ** 0.5
        w = jax.random.uniform(k1, (ci, co, k, k), jnp.float32, -bound, bound)
        b = jax.random.uniform(k2, (co,), jnp.float32, -bound, bound)
        params.append((w, b))
    return params


def pack_dense_params(params):
    """One-time weight prep, hoisted out of the forward path.

    Each ConvTranspose2d (w:(Ci,Co,K,K), b:(Co,)) is densified into the linear
    map (Ci*H*W) -> (Co*OH*OW) via the transposed-conv index rule
      out[co, ih*s - p + kh, iw*s - p + kw] += w[ci,co,kh,kw] * x[ci,ih,iw],
    then ALL layers are packed into a single (616, 896) weight slab (8-aligned
    row offsets, lane-0 column starts) and a single (8, 896) bias slab so the
    kernel has exactly 3 input DMAs.
    """
    w_slab = np.zeros((SLAB_ROWS, SLAB_COLS), np.float32)
    b_slab = np.zeros((8, SLAB_COLS), np.float32)
    for li, ((wt, b), (ci, co, k, s, p, _)) in enumerate(zip(params, LAYER_CFG)):
        kin, nout, h, w_sp, oh_n, ow_n = LAYER_DIMS[li]
        wn = np.asarray(wt, np.float32)                   # (Ci, Co, K, K)
        m = np.zeros((ci, h, w_sp, co, oh_n, ow_n), np.float32)
        for ih in range(h):
            for iw in range(w_sp):
                for kh in range(k):
                    oh = ih * s - p + kh
                    if not (0 <= oh < oh_n):
                        continue
                    for kw in range(k):
                        ow = iw * s - p + kw
                        if not (0 <= ow < ow_n):
                            continue
                        m[:, ih, iw, :, oh, ow] += wn[:, :, kh, kw]
        r0 = ROW_OFFSETS[li]
        w_slab[r0:r0 + kin, :nout] = m.reshape(kin, nout)
        b_slab[li, :nout] = np.repeat(np.asarray(b, np.float32), oh_n * ow_n)
    return jnp.asarray(w_slab), jnp.asarray(b_slab)


def _decoder_kernel(x_ref, w_ref, b_ref, o_ref):
    """Whole decoder in one kernel invocation (no grid).

    Activations stay as (B, C*H*W) f32 values in vregs; each layer is one MXU
    matmul (static slab slice) + bias row + ReLU, with an exact tanh-based
    sigmoid epilogue on the last layer.  Only the lane-dense (B, 896) slab is
    stored.
    """
    h = x_ref[...]                                        # (B, 32)
    for li in range(N_LAYERS):
        r0, kin = ROW_OFFSETS[li], K_DIMS[li]
        # last layer uses the full padded 896 columns -> lane-dense output store
        ncols = SLAB_COLS if li == N_LAYERS - 1 else N_DIMS[li]
        w = w_ref[r0:r0 + kin, :ncols]                    # free static slice
        h = jnp.dot(h, w, preferred_element_type=jnp.float32)
        h = h + b_ref[li:li + 1, :ncols]                  # (1, N) broadcast over batch
        if LAYER_CFG[li][5] == "relu":
            h = jnp.maximum(h, 0.0)
        else:
            # exact, numerically stable sigmoid: 0.5*(tanh(h/2)+1)  (EUP tanh)
            h = 0.5 * (jnp.tanh(0.5 * h) + 1.0)
    o_ref[...] = h


@jax.jit
def decoder_forward(x, w_slab, b_slab):
    B = x.shape[0]
    h0 = x.reshape(-1, Z_DIM)                             # == x.view(-1, z_dim, 1, 1), flattened

    cost = pl.CostEstimate(
        flops=2 * B * sum(k * n for k, n in zip(K_DIMS, N_DIMS)),
        transcendentals=B * FINAL_N,
        bytes_accessed=4 * (w_slab.size + b_slab.size + h0.size + B * SLAB_COLS),
    )

    out = pl.pallas_call(
        _decoder_kernel,
        out_shape=jax.ShapeDtypeStruct((B, SLAB_COLS), jnp.float32),
        in_specs=[pl.BlockSpec(memory_space=pltpu.MemorySpace.VMEM)] * 3,
        out_specs=pl.BlockSpec(memory_space=pltpu.MemorySpace.VMEM),
        cost_estimate=cost,
    )(h0, w_slab, b_slab)

    # single layout conversion at the very end: (B, 896) -> [:, :784] -> NCHW
    co = LAYER_CFG[-1][1]
    oh, ow = LAYER_DIMS[-1][4], LAYER_DIMS[-1][5]
    return out[:, :FINAL_N].reshape(B, co, oh, ow)


def decoder_reference(x, params):
    """Independent check: ConvTranspose2d == lhs-dilated conv with flipped kernel."""
    B = x.shape[0]
    h = x.reshape(B, Z_DIM, 1, 1)
    for (wt, b), (ci, co, k, s, p, act) in zip(params, LAYER_CFG):
        w_conv = jnp.transpose(wt[:, :, ::-1, ::-1], (1, 0, 2, 3))   # (Co, Ci, K, K)
        h = lax.conv_general_dilated(
            h, w_conv, window_strides=(1, 1),
            padding=[(k - 1 - p, k - 1 - p)] * 2,
            lhs_dilation=(s, s),
            dimension_numbers=("NCHW", "OIHW", "NCHW"),
            precision=lax.Precision.HIGHEST)
        h = h + b.reshape(1, co, 1, 1)
        h = jnp.maximum(h, 0.0) if act == "relu" else jax.nn.sigmoid(h)
    return h


if __name__ == "__main__":
    key = jax.random.PRNGKey(0)
    kx, kp = jax.random.split(key)
    x = jax.random.normal(kx, (2, Z_DIM), jnp.float32)    # forward views to (B, z_dim, 1, 1)
    params = init_params(kp)
    w_slab, b_slab = pack_dense_params(params)            # one-time weight prep (hoisted)

    out = decoder_forward(x, w_slab, b_slab)
    out = jax.block_until_ready(out)
    assert out.shape == (2, 1, 28, 28), out.shape

    ref = decoder_reference(x, params)
    assert jnp.allclose(out, ref, atol=1e-3, rtol=1e-3), float(jnp.max(jnp.abs(out - ref)))

    print("KERNEL_OK")
</pallas_src>

<mosaic_0001>
module attributes {stable_mosaic.version = 11 : i64} {
  func.func @_decoder_kernel(%arg0: memref<2x32xf32, #tpu.memory_space<vmem>>, %arg1: memref<616x896xf32, #tpu.memory_space<vmem>>, %arg2: memref<8x896xf32, #tpu.memory_space<vmem>>, %arg3: memref<2x896xf32, #tpu.memory_space<vmem>>) attributes {dimension_semantics = [], scalar_prefetch = 0 : i64, scratch_operands = 0 : i64, tpu.core_type = #tpu.core_type<tc>} {
    %c0 = arith.constant 0 : index
    %c0_0 = arith.constant 0 : index
    %0 = vector.load %arg0[%c0, %c0_0] : memref<2x32xf32, #tpu.memory_space<vmem>>, vector<2x32xf32>
    %c0_1 = arith.constant 0 : index
    %c0_2 = arith.constant 0 : index
    %1 = vector.load %arg1[%c0_1, %c0_2] : memref<616x896xf32, #tpu.memory_space<vmem>>, vector<32x16xf32>
    %cst = arith.constant dense<0.000000e+00> : vector<2x16xf32>
    %2 = tpu.matmul %0, %1, %cst {dimension_numbers = #tpu.dot_dimension_numbers<[1], [0], [0], [1], [0, 0, 1, 1], [], []>} : vector<2x32xf32>, vector<32x16xf32>, vector<2x16xf32> -> vector<2x16xf32>
    %c0_3 = arith.constant 0 : index
    %c0_4 = arith.constant 0 : index
    %3 = vector.load %arg2[%c0_3, %c0_4] : memref<8x896xf32, #tpu.memory_space<vmem>>, vector<1x16xf32>
    %4 = vector.broadcast %3 : vector<1x16xf32> to vector<2x16xf32>
    %5 = arith.addf %2, %4 : vector<2x16xf32>
    %cst_5 = arith.constant 0.000000e+00 : f32
    %6 = vector.broadcast %cst_5 : f32 to vector<2x16xf32>
    %7 = arith.maximumf %5, %6 : vector<2x16xf32>
    %c32 = arith.constant 32 : index
    %c0_6 = arith.constant 0 : index
    %8 = vector.load %arg1[%c32, %c0_6] : memref<616x896xf32, #tpu.memory_space<vmem>>, vector<16x32xf32>
    %cst_7 = arith.constant dense<0.000000e+00> : vector<2x32xf32>
    %9 = tpu.matmul %7, %8, %cst_7 {dimension_numbers = #tpu.dot_dimension_numbers<[1], [0], [0], [1], [0, 0, 1, 1], [], []>} : vector<2x16xf32>, vector<16x32xf32>, vector<2x32xf32> -> vector<2x32xf32>
    %c1 = arith.constant 1 : index
    %c0_8 = arith.constant 0 : index
    %10 = vector.load %arg2[%c1, %c0_8] : memref<8x896xf32, #tpu.memory_space<vmem>>, vector<1x32xf32>
    %11 = vector.broadcast %10 : vector<1x32xf32> to vector<2x32xf32>
    %12 = arith.addf %9, %11 : vector<2x32xf32>
    %cst_9 = arith.constant 0.000000e+00 : f32
    %13 = vector.broadcast %cst_9 : f32 to vector<2x32xf32>
    %14 = arith.maximumf %12, %13 : vector<2x32xf32>
    %c48 = arith.constant 48 : index
    %c0_10 = arith.constant 0 : index
    %15 = vector.load %arg1[%c48, %c0_10] : memref<616x896xf32, #tpu.memory_space<vmem>>, vector<32x144xf32>
    %cst_11 = arith.constant dense<0.000000e+00> : vector<2x144xf32>
    %16 = tpu.matmul %14, %15, %cst_11 {dimension_numbers = #tpu.dot_dimension_numbers<[1], [0], [0], [1], [0, 0, 1, 1], [], []>} : vector<2x32xf32>, vector<32x144xf32>, vector<2x144xf32> -> vector<2x144xf32>
    %c2 = arith.constant 2 : index
    %c0_12 = arith.constant 0 : index
    %17 = vector.load %arg2[%c2, %c0_12] : memref<8x896xf32, #tpu.memory_space<vmem>>, vector<1x144xf32>
    %18 = vector.broadcast %17 : vector<1x144xf32> to vector<2x144xf32>
    %19 = arith.addf %16, %18 : vector<2x144xf32>
    %cst_13 = arith.constant 0.000000e+00 : f32
    %20 = vector.broadcast %cst_13 : f32 to vector<2x144xf32>
    %21 = arith.maximumf %19, %20 : vector<2x144xf32>
    %c80 = arith.constant 80 : index
    %c0_14 = arith.constant 0 : index
    %22 = vector.load %arg1[%c80, %c0_14] : memref<616x896xf32, #tpu.memory_space<vmem>>, vector<144x392xf32>
    %cst_15 = arith.constant dense<0.000000e+00> : vector<2x392xf32>
    %23 = tpu.matmul %21, %22, %cst_15 {dimension_numbers = #tpu.dot_dimension_numbers<[1], [0], [0], [1], [0, 0, 1, 1], [], []>} : vector<2x144xf32>, vector<144x392xf32>, vector<2x392xf32> -> vector<2x392xf32>
    %c3 = arith.constant 3 : index
    %c0_16 = arith.constant 0 : index
    %24 = vector.load %arg2[%c3, %c0_16] : memref<8x896xf32, #tpu.memory_space<vmem>>, vector<1x392xf32>
    %25 = vector.broadcast %24 : vector<1x392xf32> to vector<2x392xf32>
    %26 = arith.addf %23, %25 : vector<2x392xf32>
    %cst_17 = arith.constant 0.000000e+00 : f32
    %27 = vector.broadcast %cst_17 : f32 to vector<2x392xf32>
    %28 = arith.maximumf %26, %27 : vector<2x392xf32>
    %c224 = arith.constant 224 : index
    %c0_18 = arith.constant 0 : index
    %29 = vector.load %arg1[%c224, %c0_18] : memref<616x896xf32, #tpu.memory_space<vmem>>, vector<392x896xf32>
    %cst_19 = arith.constant dense<0.000000e+00> : vector<2x896xf32>
    %30 = tpu.matmul %28, %29, %cst_19 {dimension_numbers = #tpu.dot_dimension_numbers<[1], [0], [0], [1], [0, 0, 1, 1], [], []>} : vector<2x392xf32>, vector<392x896xf32>, vector<2x896xf32> -> vector<2x896xf32>
    %c4 = arith.constant 4 : index
    %c0_20 = arith.constant 0 : index
    %31 = vector.load %arg2[%c4, %c0_20] : memref<8x896xf32, #tpu.memory_space<vmem>>, vector<1x896xf32>
    %32 = vector.broadcast %31 : vector<1x896xf32> to vector<2x896xf32>
    %33 = arith.addf %30, %32 : vector<2x896xf32>
    %cst_21 = arith.constant 5.000000e-01 : f32
    %34 = vector.broadcast %cst_21 : f32 to vector<2x896xf32>
    %35 = arith.mulf %34, %33 : vector<2x896xf32>
    %36 = math.tanh %35 : vector<2x896xf32>
    %cst_22 = arith.constant 1.000000e+00 : f32
    %37 = vector.broadcast %cst_22 : f32 to vector<2x896xf32>
    %38 = arith.addf %36, %37 : vector<2x896xf32>
    %cst_23 = arith.constant 5.000000e-01 : f32
    %39 = vector.broadcast %cst_23 : f32 to vector<2x896xf32>
    %40 = arith.mulf %39, %38 : vector<2x896xf32>
    %c0_24 = arith.constant 0 : index
    %c0_25 = arith.constant 0 : index
    %41 = vector.load %arg3[%c0_24, %c0_25] : memref<2x896xf32, #tpu.memory_space<vmem>>, vector<2x896xf32>
    tpu.vector_store %arg3[%c0_24, %c0_25], %40 {strides = array<i32>} : memref<2x896xf32, #tpu.memory_space<vmem>>, vector<2x896xf32>,
    return
  }
}

</mosaic_0001>

<bundles_post_ra>
// kernel: decoder_forward.1
= control target key start
LH: loop header
LB: loop body
LE: loop exit
PB: predicated region body
PF: predicated region fallthrough
CT: control target
= control target key end

     0   :  { %8 = vsyncpa [#allocation3], 0  ;;  %s1636_s0 = inlined_call_operand.hbm [shape: f32[2,32], index: 0, kind: input, shape index: {}]   ;;  %s1637_s1 = inlined_call_operand.hbm [shape: f32[616,896], index: 1, kind: input, shape index: {}]   ;;  %s1638_s2 = inlined_call_operand.hbm [shape: f32[8,896], index: 2, kind: input, shape index: {}]   ;;  %s1639_s3 = inlined_call_operand.vmem [shape: f32[2,896], index: 3, kind: output, shape index: {}]  }
   0x1   :  { %9 = vsyncpa [#allocation5], 0  ;;  %s25_s14 = sshll.u32 %s1637_s1, 4  ;;  %s1520_s15 = smov [#allocation4]   ;;  %s26_s14 = int_to_ptr.hbm [resolvable:$true] %s25_s14 }
   0x2   :  { %s27_s16 = sshll.u32 %s1520_s15, 4  ;;  %s15_s19 = sshll.u32 %s1636_s0, 4  ;;  %s28_s16 = int_to_ptr.vmem [resolvable:$true] %s27_s16  ;;  %s16_s19 = int_to_ptr.hbm [resolvable:$true] %s15_s19 }
   0x3   :  { %s1521_s20 = smov 896   ;;  %s1522_s21 = smov 56  }
   0x4   :  { %33 = dma.hbm_to_vmem [thread:$0]  %s26_s14, 68992, %s28_s16, [#allocation5], %s1521_s20, %s1521_s20, %s1522_s21  }
   0x5   :  { %s1523_s22 = smov [#allocation2]   ;;  %s39_s26 = sshll.u32 %s1638_s2, 4  ;;  %s40_s26 = int_to_ptr.hbm [resolvable:$true] %s39_s26 }
   0x6   :  { %s17_s23 = sshll.u32 %s1523_s22, 4  ;;  %s1524_s1 = smov [#allocation6]   ;;  %s18_s23 = int_to_ptr.vmem [resolvable:$true] %s17_s23 }
   0x7   :  { %20 = dma.hbm_to_vmem [thread:$0]  %s16_s19, 32, %s18_s23, [#allocation3]  }
   0x8   :  { %s41_s27 = sshll.u32 %s1524_s1, 4  ;;  %s42_s27 = int_to_ptr.vmem [resolvable:$true] %s41_s27 }
   0x9   :  { %44 = dma.hbm_to_vmem [thread:$0]  %s40_s26, 896, %s42_s27, [#allocation5]  }
   0xa   :  { %1516 = dma.done.wait [#allocation3], 32  }
   0xb   :  { %1517 = vsyncadd [#allocation3], 4294967264 }
   0xc   :  { %1518 = dma.done.wait [#allocation5], 69888  }
   0xd   :  { %1519 = vsyncadd [#allocation5], 4294897408  ;;  %v61_v0 = vld [vmem:[#allocation4 + $0xa8] sm:$0xff]  ;;  %v60_v1 = vld [vmem:[#allocation4 + $0x70] sm:$0xff]  ;;  %vm63_vm0 = vcmask 261120   ;;  %vm91_vm1 = vcmask 130048  }
   0xe   :  { %79 = vmatpush.msra.mxu0 %v61_v0  ;;  %v59_v2 = vld [vmem:[#allocation4 + $0x38] sm:$0xff]  ;;  %v58_v3 = vld [vmem:[#allocation4] sm:$0xff]  ;;  %v121_v14 = vld [vmem:[#allocation4 + $0x1c8] sm:$0xff]  ;;  %vm788_vm2 = vcmask 64512   ;;  %vm1392_vm3 = vcmask 1041408   ;;  %vm1394_vm4 = vcmask 1045508  }
   0xf   :  { %v57_v4 = vld [vmem:[#allocation2] sm:$0x3]  ;;  %v88_v6 = vld [vmem:[#allocation4 + $0xe0] sm:$0xff]  ;;  %v62_v9 = vld [vmem:[#allocation6] ss:$0 sm:$0xff]  ;;  %vm1396_vm5 = vcmask 1043456  }
  0x10   :  { %80 = vmatpush.msra.mxu0 %v60_v1  ;;  %v89_v5 = vld [vmem:[#allocation4 + $0x118] sm:$0xff]  ;;  %v123_v8 = vld [vmem:[#allocation4 + $0x200] sm:$0xff]  ;;  %v118_v15 = vld [vmem:[#allocation4 + $0x188] sm:$0xff] }
  0x11   :  { %109 = vmatpush.msra.mxu1 %v89_v5  ;;  %v122_v7 = vld [vmem:[#allocation4 + $0x1f8] sm:$0xff]  ;;  %166 = vmatpush.msra.mxu3 %v123_v8  ;;  %v120_v13 = vld [vmem:[#allocation4 + $0x1c0] sm:$0xff]  ;;  %v119_v16 = vld [vmem:[#allocation4 + $0x190] sm:$0xff] }
  0x12   :  { %81 = vmatpush.msra.mxu0 %v59_v2  ;;  %v116_v17 = vld [vmem:[#allocation4 + $0x150] sm:$0xff]  ;;  %v117_v18 = vld [vmem:[#allocation4 + $0x158] sm:$0xff]  ;;  %v237_v20 = vld [vmem:[#allocation4 + $0x580] sm:$0xff] }
  0x13   :  { %110 = vmatpush.msra.mxu1 %v88_v6  ;;  %167 = vmatpush.msra.mxu3 %v121_v14  ;;  %v236_v19 = vld [vmem:[#allocation4 + $0x578] sm:$0xff]  ;;  %v232_v21 = vld [vmem:[#allocation4 + $0x540] sm:$0xff]  ;;  %v233_v22 = vld [vmem:[#allocation4 + $0x548] sm:$0xff] }
  0x14   :  { %82 = vmatpush.msra.mxu0 %v58_v3  ;;  %302 = vmatpush.msra.mxu2 %v237_v20  ;;  %v228_v23 = vld [vmem:[#allocation4 + $0x508] sm:$0xff]  ;;  %v229_v24 = vld [vmem:[#allocation4 + $0x510] sm:$0xff]  ;;  %v225_v26 = vld [vmem:[#allocation4 + $0x4d8] sm:$0xff] }
  0x15   :  { %1410 = vmatmul.msk.f32.vlgmr.msra.gmra.mxu0 %vm63_vm0, %v57_v4  ;;  %146 = vmatpush.msrb.mxu1 %v122_v7  ;;  %v224_v25 = vld [vmem:[#allocation4 + $0x4d0] sm:$0xff]  ;;  %v244_v27 = vld [vmem:[#allocation4 + $0x5e8] sm:$0xff]  ;;  %v220_v29 = vld [vmem:[#allocation4 + $0x498] sm:$0xff] }
  0x16   :  { %168 = vmatpush.msra.mxu3 %v119_v16  ;;  %303 = vmatpush.msra.mxu2 %v233_v22  ;;  %v240_v28 = vld [vmem:[#allocation4 + $0x5b0] sm:$0xff]  ;;  %v221_v30 = vld [vmem:[#allocation4 + $0x4a0] sm:$0xff]  ;;  %v238_v31 = vld [vmem:[#allocation4 + $0x588] sm:$0xff] }
  0x17   :  { %147 = vmatpush.msrb.mxu1 %v120_v13  ;;  %296 = vmatpush.msrb.mxu0 %v244_v27  ;;  %v216_v32 = vld [vmem:[#allocation4 + $0x460] sm:$0xff]  ;;  %v217_v33 = vld [vmem:[#allocation4 + $0x468] sm:$0xff]  ;;  %v234_v34 = vld [vmem:[#allocation4 + $0x550] sm:$0xff] }
  0x18   :  { %169 = vmatpush.msra.mxu3 %v117_v18  ;;  %304 = vmatpush.msra.mxu2 %v229_v24  ;;  %v212_v35 = vld [vmem:[#allocation4 + $0x428] sm:$0xff]  ;;  %v213_v36 = vld [vmem:[#allocation4 + $0x430] sm:$0xff]  ;;  %v230_v37 = vld [vmem:[#allocation4 + $0x518] sm:$0xff] }
  0x19   :  { %148 = vmatpush.msrb.mxu1 %v118_v15  ;;  %297 = vmatpush.msrb.mxu0 %v240_v28  ;;  %v208_v38 = vld [vmem:[#allocation4 + $0x3f0] sm:$0xff]  ;;  %v209_v39 = vld [vmem:[#allocation4 + $0x3f8] sm:$0xff]  ;;  %v226_v40 = vld [vmem:[#allocation4 + $0x4e0] sm:$0xff] }
  0x1a   :  { %305 = vmatpush.msra.mxu2 %v225_v26  ;;  %v204_v41 = vld [vmem:[#allocation4 + $0x3b8] sm:$0xff]  ;;  %v205_v42 = vld [vmem:[#allocation4 + $0x3c0] sm:$0xff]  ;;  %v222_v43 = vld [vmem:[#allocation4 + $0x4a8] sm:$0xff] }
  0x1b   :  { %149 = vmatpush.msrb.mxu1 %v116_v17  ;;  %342 = vmatpush.msra.mxu0 %v238_v31  ;;  %v200_v44 = vld [vmem:[#allocation4 + $0x380] sm:$0xff]  ;;  %v201_v45 = vld [vmem:[#allocation4 + $0x388] sm:$0xff]  ;;  %v218_v46 = vld [vmem:[#allocation4 + $0x470] sm:$0xff] }
  0x1c   :  { %306 = vmatpush.msra.mxu2 %v221_v30  ;;  %v196_v47 = vld [vmem:[#allocation4 + $0x348] sm:$0xff]  ;;  %v197_v48 = vld [vmem:[#allocation4 + $0x350] sm:$0xff]  ;;  %v193_v50 = vld [vmem:[#allocation4 + $0x318] sm:$0xff] }
  0x1d   :  { %343 = vmatpush.msra.mxu0 %v234_v34  ;;  %v192_v49 = vld [vmem:[#allocation4 + $0x310] sm:$0xff]  ;;  %v188_v51 = vld [vmem:[#allocation4 + $0x2d8] sm:$0xff]  ;;  %v189_v52 = vld [vmem:[#allocation4 + $0x2e0] sm:$0xff] }
  0x1e   :  { %307 = vmatpush.msra.mxu2 %v217_v33  ;;  %v90_v53 = vld [vmem:[#allocation6 + $0x1] ss:$0 sm:$0xff]  ;;  %v184_v57 = vld [vmem:[#allocation4 + $0x2a0] sm:$0xff]  ;;  %v185_v58 = vld [vmem:[#allocation4 + $0x2a8] sm:$0xff] }
  0x1f   :  { %344 = vmatpush.msra.mxu0 %v230_v37  ;;  %v214_v59 = vld [vmem:[#allocation4 + $0x438] sm:$0xff]  ;;  %v180_v60 = vld [vmem:[#allocation4 + $0x268] sm:$0xff]  ;;  %v181_v61 = vld [vmem:[#allocation4 + $0x270] sm:$0xff] }
  0x20   :  { %308 = vmatpush.msra.mxu2 %v213_v36  ;;  %v210_v62 = vld [vmem:[#allocation4 + $0x400] sm:$0xff]  ;;  %v176_v63 = vld [vmem:[#allocation4 + $0x230] sm:$0xff]  ;;  %v177_v0 = vld [vmem:[#allocation4 + $0x238] sm:$0xff] }
  0x21   :  { %345 = vmatpush.msra.mxu0 %v226_v40  ;;  %v206_v1 = vld [vmem:[#allocation4 + $0x3c8] sm:$0xff]  ;;  %v245_v2 = vld [vmem:[#allocation4 + $0x5f0] sm:$0xff]  ;;  %v241_v4 = vld [vmem:[#allocation4 + $0x5b8] sm:$0xff] }
  0x22   :  { %309 = vmatpush.msra.mxu2 %v209_v39  ;;  %336 = vmatpush.msrb.mxu3 %v245_v2  ;;  %v202_v3 = vld [vmem:[#allocation4 + $0x390] sm:$0xff]  ;;  %v198_v5 = vld [vmem:[#allocation4 + $0x358] sm:$0xff]  ;;  %v194_v7 = vld [vmem:[#allocation4 + $0x320] sm:$0xff] }
  0x23   :  { %346 = vmatpush.msra.mxu0 %v222_v43  ;;  %v246_v6 = vld [vmem:[#allocation4 + $0x5f8] sm:$0xff]  ;;  %v242_v8 = vld [vmem:[#allocation4 + $0x5c0] sm:$0xff]  ;;  %v239_v24 = vld [vmem:[#allocation4 + $0x590] sm:$0xff] }
  0x24   :  { %310 = vmatpush.msra.mxu2 %v205_v42  ;;  %337 = vmatpush.msrb.mxu3 %v241_v4  ;;  %v182_v13 = vld [vmem:[#allocation4 + $0x278] sm:$0xff]  ;;  %v178_v14 = vld [vmem:[#allocation4 + $0x240] sm:$0xff]  ;;  %v531_v26 = vld [vmem:[#allocation4 + $0x968] sm:$0xff] }
  0x25   :  { %347 = vmatpush.msra.mxu0 %v218_v46  ;;  %v125_v15 = vld [vmem:[#allocation6 + $0x2] ss:$8 sm:$0x3]  ;;  %v524_v27 = vld [vmem:[#allocation4 + $0x930] sm:$0xff]  ;;  %v643_v30 = vld [vmem:[#allocation4 + $0xce8] sm:$0xff] }
  0x26   :  { %311 = vmatpush.msra.mxu2 %v201_v45  ;;  %v127_v16 = vperm.slane %v125_v15, 0  ;;  %v128_v20 = vperm.slane %v125_v15, 1  ;;  %v231_v28 = vld [vmem:[#allocation4 + $0x520] sm:$0xff]  ;;  %v636_v31 = vld [vmem:[#allocation4 + $0xcb0] sm:$0xff]  ;;  %v629_v36 = vld [vmem:[#allocation4 + $0xc78] sm:$0xff] }
  0x27   :  { %348 = vmatpush.msra.mxu0 %v214_v59  ;;  %v510_v33 = vld [vmem:[#allocation4 + $0x8c0] sm:$0xff]  ;;  %v223_v34 = vld [vmem:[#allocation4 + $0x4b0] sm:$0xff]  ;;  %v219_v37 = vld [vmem:[#allocation4 + $0x478] sm:$0xff] }
  0x28   :  { %312 = vmatpush.msra.mxu2 %v197_v48  ;;  %v622_v39 = vld [vmem:[#allocation4 + $0xc40] sm:$0xff]  ;;  %v615_v42 = vld [vmem:[#allocation4 + $0xc08] sm:$0xff]  ;;  %v608_v45 = vld [vmem:[#allocation4 + $0xbd0] sm:$0xff] }
  0x29   :  { %349 = vmatpush.msra.mxu0 %v210_v62  ;;  %v215_v40 = vld [vmem:[#allocation4 + $0x440] sm:$0xff]  ;;  %v211_v43 = vld [vmem:[#allocation4 + $0x408] sm:$0xff]  ;;  %v191_v62 = vld [vmem:[#allocation4 + $0x2f0] sm:$0xff] }
  0x2a   :  { %313 = vmatpush.msra.mxu2 %v193_v50  ;;  %v755_v46 = vld [vmem:[#allocation4 + $0x1068] sm:$0xff]  ;;  %v601_v50 = vld [vmem:[#allocation4 + $0xb98] sm:$0xff]  ;;  %v440_v2 = vld [vmem:[#allocation4 + $0x690] sm:$0xff] }
  0x2b   :  { %350 = vmatpush.msra.mxu0 %v206_v1  ;;  %v475_v48 = vld [vmem:[#allocation4 + $0x7a8] sm:$0xff]  ;;  %v187_v1 = vld [vmem:[#allocation4 + $0x2b8] sm:$0xff]  ;;  %v183_v4 = vld [vmem:[#allocation4 + $0x280] sm:$0xff] }
  0x2c   :  { %314 = vmatpush.msra.mxu2 %v189_v52  ;;  %v468_v52 = vld [vmem:[#allocation4 + $0x770] sm:$0xff]  ;;  %v195_v59 = vld [vmem:[#allocation4 + $0x328] sm:$0xff] }
  0x2d   :  { %351 = vmatpush.msra.mxu0 %v202_v3  ;;  %v566_v3 = vld [vmem:[#allocation4 + $0xa80] sm:$0xff]  ;;  %v623_v15 = vld [vmem:[#allocation4 + $0xc48] sm:$0xff] }
  0x2e   :  { %315 = vmatpush.msra.mxu2 %v185_v58  ;;  %v587_v58 = vld [vmem:[#allocation4 + $0xb28] sm:$0xff] }
  0x2f   :  { %352 = vmatpush.msra.mxu0 %v198_v5  ;;  %v433_v5 = vld [vmem:[#allocation4 + $0x658] sm:$0xff] }
  0x30   :  { %316 = vmatpush.msra.mxu2 %v181_v61  ;;  %v580_v61 = vld [vmem:[#allocation4 + $0xaf0] sm:$0xff] }
  0x31   :  { %353 = vmatpush.msra.mxu0 %v194_v7  ;;  %v179_v7 = vld [vmem:[#allocation4 + $0x248] sm:$0xff] }
  0x32   :  { %317 = vmatpush.msra.mxu2 %v177_v0  ;;  %v573_v0 = vld [vmem:[#allocation4 + $0xab8] sm:$0xff] }
  0x34   :  { %792 = vmatpush.msrb.mxu2 %v531_v26  ;;  %v574_v26 = vld [vmem:[#allocation4 + $0xac0] sm:$0xff] }
  0x36   :  { %793 = vmatpush.msrb.mxu2 %v524_v27  ;;  %v727_v27 = vld [vmem:[#allocation4 + $0xf88] sm:$0xff] }
  0x92   :  { %v84_v10 = vpop.f32.mrf.mxu0 }
  0x93   :  { %v85_v11 = vadd.f32 %v84_v10, %v62_v9  ;;  %v247_v9 = vld [vmem:[#allocation4 + $0x600] sm:$0xff]  ;;  %v190_v10 = vld [vmem:[#allocation4 + $0x2e8] sm:$0xff] }
  0x94   :  { %354 = vmatpush.msra.mxu0 %v190_v10  ;;  %v552_v10 = vld [vmem:[#allocation4 + $0xa10] sm:$0xff] }
  0x95   :  { %v87_v12 = vmax.f32 %v85_v11, 0.0  ;;  %v243_v11 = vld [vmem:[#allocation4 + $0x5c8] sm:$0xff] }
  0x97   :  { %1411 = vmatmul.msk.f32.vlgmr.msra.gmra.mxu1 %vm91_vm1, %v87_v12  ;;  %v186_v12 = vld [vmem:[#allocation4 + $0x2b0] sm:$0xff] }
  0x98   :  { %262 = vmatpush.msra.mxu1 %v236_v19  ;;  %355 = vmatpush.msra.mxu0 %v186_v12  ;;  %v545_v12 = vld [vmem:[#allocation4 + $0x9d8] sm:$0xff] }
  0x9a   :  { %263 = vmatpush.msra.mxu1 %v232_v21  ;;  %356 = vmatpush.msra.mxu0 %v182_v13  ;;  %v630_v13 = vld [vmem:[#allocation4 + $0xc80] sm:$0xff] }
  0x9c   :  { %264 = vmatpush.msra.mxu1 %v228_v23  ;;  %357 = vmatpush.msra.mxu0 %v178_v14  ;;  %v538_v14 = vld [vmem:[#allocation4 + $0x9a0] sm:$0xff] }
  0x9e   :  { %265 = vmatpush.msra.mxu1 %v224_v25  ;;  %v235_v25 = vld [vmem:[#allocation4 + $0x558] sm:$0xff] }
  0xa0   :  { %266 = vmatpush.msra.mxu1 %v220_v29  ;;  %v517_v29 = vld [vmem:[#allocation4 + $0x8f8] sm:$0xff] }
  0xa1   :  { %794 = vmatpush.msrb.mxu2 %v517_v29  ;;  %v567_v29 = vld [vmem:[#allocation4 + $0xa88] sm:$0xff] }
  0xa2   :  { %267 = vmatpush.msra.mxu1 %v216_v32  ;;  %v227_v32 = vld [vmem:[#allocation4 + $0x4e8] sm:$0xff] }
  0xa3   :  { %795 = vmatpush.msrb.mxu2 %v510_v33  ;;  %v713_v33 = vld [vmem:[#allocation4 + $0xf18] sm:$0xff] }
  0xa4   :  { %268 = vmatpush.msra.mxu1 %v212_v35  ;;  %v503_v35 = vld [vmem:[#allocation4 + $0x888] sm:$0xff] }
  0xa5   :  { %796 = vmatpush.msrb.mxu2 %v503_v35  ;;  %v553_v35 = vld [vmem:[#allocation4 + $0xa18] sm:$0xff] }
  0xa6   :  { %269 = vmatpush.msra.mxu1 %v208_v38  ;;  %v496_v38 = vld [vmem:[#allocation4 + $0x850] sm:$0xff] }
  0xa7   :  { %797 = vmatpush.msrb.mxu2 %v496_v38  ;;  %v546_v38 = vld [vmem:[#allocation4 + $0x9e0] sm:$0xff] }
  0xa8   :  { %270 = vmatpush.msra.mxu1 %v204_v41  ;;  %v489_v41 = vld [vmem:[#allocation4 + $0x818] sm:$0xff] }
  0xa9   :  { %798 = vmatpush.msrb.mxu2 %v489_v41  ;;  %v539_v41 = vld [vmem:[#allocation4 + $0x9a8] sm:$0xff] }
  0xaa   :  { %271 = vmatpush.msra.mxu1 %v200_v44  ;;  %v482_v44 = vld [vmem:[#allocation4 + $0x7e0] sm:$0xff] }
  0xab   :  { %799 = vmatpush.msrb.mxu2 %v482_v44  ;;  %v685_v44 = vld [vmem:[#allocation4 + $0xe38] sm:$0xff] }
  0xac   :  { %272 = vmatpush.msra.mxu1 %v196_v47  ;;  %v207_v47 = vld [vmem:[#allocation4 + $0x3d0] sm:$0xff] }
  0xad   :  { %800 = vmatpush.msrb.mxu2 %v475_v48  ;;  %v671_v48 = vld [vmem:[#allocation4 + $0xdc8] sm:$0xff] }
  0xae   :  { %273 = vmatpush.msra.mxu1 %v192_v49  ;;  %v748_v49 = vld [vmem:[#allocation4 + $0x1030] sm:$0xff] }
  0xaf   :  { %801 = vmatpush.msrb.mxu2 %v468_v52  ;;  %v532_v52 = vld [vmem:[#allocation4 + $0x970] sm:$0xff] }
  0xb0   :  { %274 = vmatpush.msra.mxu1 %v188_v51  ;;  %v203_v51 = vld [vmem:[#allocation4 + $0x398] sm:$0xff] }
  0xb2   :  { %275 = vmatpush.msra.mxu1 %v184_v57  ;;  %v734_v57 = vld [vmem:[#allocation4 + $0xfc0] sm:$0xff] }
  0xb4   :  { %276 = vmatpush.msra.mxu1 %v180_v60  ;;  %v454_v60 = vld [vmem:[#allocation4 + $0x700] sm:$0xff] }
  0xb6   :  { %277 = vmatpush.msra.mxu1 %v176_v63  ;;  %v447_v63 = vld [vmem:[#allocation4 + $0x6c8] sm:$0xff] }
 0x114   :  { %v112_v54 = vpop.f32.mrf.mxu1 }
 0x115   :  { %v113_v55 = vadd.f32 %v112_v54, %v90_v53  ;;  %v741_v53 = vld [vmem:[#allocation4 + $0xff8] sm:$0xff]  ;;  %v594_v54 = vld [vmem:[#allocation4 + $0xb60] sm:$0xff] }
 0x117   :  { %v115_v56 = vmax.f32 %v113_v55, 0.0  ;;  %v199_v55 = vld [vmem:[#allocation4 + $0x360] sm:$0xff] }
 0x119   :  { %1412 = vmatmul.msk.f32.vlgmr.msrb.gmra.mxu1 %vm63_vm0, %v115_v56  ;;  %1413 = vmatmul.msk.f32.vlgmr.msra.gmra.mxu3 %vm63_vm0, %v115_v56  ;;  %v461_v56 = vld [vmem:[#allocation4 + $0x738] sm:$0xff] }
 0x11a   :  { %376 = vmatpush.msra.mxu3 %v246_v6  ;;  %416 = vmatpush.msrb.mxu1 %v247_v9  ;;  %v559_v6 = vld [vmem:[#allocation4 + $0xa48] sm:$0xff]  ;;  %v644_v9 = vld [vmem:[#allocation4 + $0xcf0] sm:$0xff] }
 0x11b   :  { %802 = vmatpush.msrb.mxu2 %v461_v56  ;;  %v658_v56 = vld [vmem:[#allocation4 + $0xd60] sm:$0xff] }
 0x11c   :  { %377 = vmatpush.msra.mxu3 %v242_v8  ;;  %417 = vmatpush.msrb.mxu1 %v243_v11  ;;  %v426_v8 = vld [vmem:[#allocation4 + $0x620] sm:$0xff]  ;;  %v637_v11 = vld [vmem:[#allocation4 + $0xcb8] sm:$0xff] }
 0x11d   :  { %803 = vmatpush.msrb.mxu2 %v454_v60  ;;  %v763_v60 = vld [vmem:[#allocation4 + $0x10a8] sm:$0xff] }
 0x11f   :  { %804 = vmatpush.msrb.mxu2 %v447_v63  ;;  %v497_v63 = vld [vmem:[#allocation4 + $0x858] sm:$0xff] }
 0x121   :  { %805 = vmatpush.msrb.mxu2 %v440_v2 }
 0x123   :  { %806 = vmatpush.msrb.mxu2 %v433_v5  ;;  %v476_v5 = vld [vmem:[#allocation4 + $0x7b0] sm:$0xff] }
 0x125   :  { %807 = vmatpush.msrb.mxu2 %v426_v8 }
 0x196   :  { %v151_v17 = vpop.f32.mrf.mxu1 }
 0x197   :  { %v152_v18 = vadd.f32 %v151_v17, %v127_v16  ;;  %v756_v16 = vld [vmem:[#allocation4 + $0x1070] sm:$0xff] }
 0x198   :  { %v616_v17 = vld [vmem:[#allocation4 + $0xc10] sm:$0xff] }
 0x199   :  { %v1558_v19 = vmax.f32 %v152_v18, 0.0  ;;  %v749_v18 = vld [vmem:[#allocation4 + $0x1038] sm:$0xff] }
 0x19b   :  { %278 = vmatmul.f32.vlgmr.msra.gmra.mxu1 %v1558_v19  ;;  %318 = vmatmul.f32.vlgmr.msra.gmra.mxu2 %v1558_v19 }
 0x19c   :  { %v171_v21 = vpop.f32.mrf.mxu3  ;;  %812 = vmatpush.msra.mxu1 %v643_v30  ;;  %892 = vmatpush.msra.mxu2 %v644_v9  ;;  %v720_v30 = vld [vmem:[#allocation4 + $0xf50] sm:$0xff] }
 0x19d   :  { %v172_v22 = vadd.f32 %v171_v21, %v128_v20  ;;  %v609_v20 = vld [vmem:[#allocation4 + $0xbd8] sm:$0xff]  ;;  %v742_v21 = vld [vmem:[#allocation4 + $0x1000] sm:$0xff] }
 0x19e   :  { %813 = vmatpush.msra.mxu1 %v636_v31  ;;  %893 = vmatpush.msra.mxu2 %v637_v11  ;;  %v721_v31 = vld [vmem:[#allocation4 + $0xf58] sm:$0xff]  ;;  %v462_v11 = vld [vmem:[#allocation4 + $0x740] sm:$0xff] }
 0x19f   :  { %v175_v23 = vmax.f32 %v172_v22, 0.0  ;;  %v735_v22 = vld [vmem:[#allocation4 + $0xfc8] sm:$0xff] }
 0x1a0   :  { %814 = vmatpush.msra.mxu1 %v629_v36  ;;  %894 = vmatpush.msra.mxu2 %v630_v13  ;;  %v706_v36 = vld [vmem:[#allocation4 + $0xee0] sm:$0xff] }
 0x1a1   :  { %1414 = vmatmul.msk.f32.vlgmr.msrb.gmra.mxu0 %vm91_vm1, %v175_v23  ;;  %1415 = vmatmul.msk.f32.vlgmr.msrb.gmra.mxu3 %vm91_vm1, %v175_v23 }
 0x1a2   :  { %382 = vmatpush.msrb.mxu3 %v239_v24  ;;  %815 = vmatpush.msra.mxu1 %v622_v39  ;;  %v588_v24 = vld [vmem:[#allocation4 + $0xb30] sm:$0xff]  ;;  %v699_v39 = vld [vmem:[#allocation4 + $0xea8] sm:$0xff] }
 0x1a3   :  { %1417 = vmatmul.msk.f32.vlgmr.msrb.gmra.mxu1 %vm91_vm1, %v175_v23  ;;  %832 = vmatpush.msrb.mxu0 %v755_v46  ;;  %v678_v46 = vld [vmem:[#allocation4 + $0xe00] sm:$0xff] }
 0x1a4   :  { %383 = vmatpush.msrb.mxu3 %v235_v25  ;;  %816 = vmatpush.msra.mxu1 %v615_v42  ;;  %v581_v25 = vld [vmem:[#allocation4 + $0xaf8] sm:$0xff]  ;;  %v692_v42 = vld [vmem:[#allocation4 + $0xe70] sm:$0xff] }
 0x1a5   :  { %833 = vmatpush.msrb.mxu0 %v748_v49  ;;  %895 = vmatpush.msra.mxu2 %v623_v15  ;;  %v672_v49 = vld [vmem:[#allocation4 + $0xdd0] sm:$0xff]  ;;  %v455_v15 = vld [vmem:[#allocation4 + $0x708] sm:$0xff] }
 0x1a6   :  { %384 = vmatpush.msrb.mxu3 %v231_v28  ;;  %817 = vmatpush.msra.mxu1 %v608_v45  ;;  %v728_v28 = vld [vmem:[#allocation4 + $0xf90] sm:$0xff]  ;;  %v686_v45 = vld [vmem:[#allocation4 + $0xe40] sm:$0xff] }
 0x1a7   :  { %834 = vmatpush.msrb.mxu0 %v741_v53  ;;  %896 = vmatpush.msra.mxu2 %v616_v17  ;;  %v665_v53 = vld [vmem:[#allocation4 + $0xd98] sm:$0xff]  ;;  %v750_v17 = vld [vmem:[#allocation4 + $0x1040] sm:$0xff] }
 0x1a8   :  { %385 = vmatpush.msrb.mxu3 %v227_v32  ;;  %818 = vmatpush.msra.mxu1 %v601_v50  ;;  %v560_v32 = vld [vmem:[#allocation4 + $0xa50] sm:$0xff]  ;;  %v762_v50 = vld [vmem:[#allocation4 + $0x10a0] sm:$0xff] }
 0x1a9   :  { %358 = vmatmul.f32.vlgmr.msra.gmra.mxu0 %v1558_v19  ;;  %1416 = vmatmul.msk.f32.vlgmr.msra.gmra.mxu3 %vm91_vm1, %v175_v23  ;;  %v595_v23 = vld [vmem:[#allocation4 + $0xb68] sm:$0xff] }
 0x1aa   :  { %386 = vmatpush.msrb.mxu3 %v223_v34  ;;  %819 = vmatpush.msra.mxu1 %v594_v54  ;;  %v714_v34 = vld [vmem:[#allocation4 + $0xf20] sm:$0xff]  ;;  %v657_v54 = vld [vmem:[#allocation4 + $0xd58] sm:$0xff] }
 0x1ab   :  { %835 = vmatpush.msrb.mxu0 %v734_v57  ;;  %897 = vmatpush.msra.mxu2 %v609_v20  ;;  %v650_v57 = vld [vmem:[#allocation4 + $0xd20] sm:$0xff]  ;;  %v448_v20 = vld [vmem:[#allocation4 + $0x6d0] sm:$0xff] }
 0x1ac   :  { %387 = vmatpush.msrb.mxu3 %v219_v37  ;;  %820 = vmatpush.msra.mxu1 %v587_v58  ;;  %v707_v37 = vld [vmem:[#allocation4 + $0xee8] sm:$0xff]  ;;  %v518_v58 = vld [vmem:[#allocation4 + $0x900] sm:$0xff] }
 0x1ad   :  { %836 = vmatpush.msrb.mxu0 %v727_v27 }
 0x1ae   :  { %388 = vmatpush.msrb.mxu3 %v215_v40  ;;  %821 = vmatpush.msra.mxu1 %v580_v61  ;;  %v700_v40 = vld [vmem:[#allocation4 + $0xeb0] sm:$0xff]  ;;  %v511_v61 = vld [vmem:[#allocation4 + $0x8c8] sm:$0xff] }
 0x1af   :  { %837 = vmatpush.msrb.mxu0 %v720_v30  ;;  %v427_v30 = vld [vmem:[#allocation4 + $0x628] sm:$0xff] }
 0x1b0   :  { %389 = vmatpush.msrb.mxu3 %v211_v43  ;;  %822 = vmatpush.msra.mxu1 %v573_v0  ;;  %v693_v43 = vld [vmem:[#allocation4 + $0xe78] sm:$0xff] }
 0x1b1   :  { %838 = vmatpush.msrb.mxu0 %v713_v33  ;;  %v1568_v0 = vld [vmem:[#allocation6 + $0x3] ss:$8 sm:$0xf] }
 0x1b2   :  { %390 = vmatpush.msrb.mxu3 %v207_v47  ;;  %823 = vmatpush.msra.mxu1 %v566_v3  ;;  %v679_v47 = vld [vmem:[#allocation4 + $0xe08] sm:$0xff]  ;;  %v251_v2 = vperm.slane %v1568_v0, 0 }
 0x1b3   :  { %839 = vmatpush.msrb.mxu0 %v706_v36  ;;  %v483_v3 = vld [vmem:[#allocation4 + $0x7e8] sm:$0xff] }
 0x1b4   :  { %391 = vmatpush.msrb.mxu3 %v203_v51  ;;  %824 = vmatpush.msra.mxu1 %v559_v6  ;;  %v664_v51 = vld [vmem:[#allocation4 + $0xd90] sm:$0xff] }
 0x1b5   :  { %840 = vmatpush.msrb.mxu0 %v699_v39  ;;  %v534_v39 = vld [vmem:[#allocation4 + $0x980] sm:$0xff] }
 0x1b6   :  { %392 = vmatpush.msrb.mxu3 %v199_v55  ;;  %825 = vmatpush.msra.mxu1 %v552_v10  ;;  %v525_v55 = vld [vmem:[#allocation4 + $0x938] sm:$0xff]  ;;  %v252_v10 = vperm.slane %v1568_v0, 1 }
 0x1b7   :  { %841 = vmatpush.msrb.mxu0 %v692_v42  ;;  %v527_v42 = vld [vmem:[#allocation4 + $0x948] sm:$0xff] }
 0x1b8   :  { %393 = vmatpush.msrb.mxu3 %v195_v59  ;;  %826 = vmatpush.msra.mxu1 %v545_v12  ;;  %v651_v59 = vld [vmem:[#allocation4 + $0xd28] sm:$0xff] }
 0x1b9   :  { %842 = vmatpush.msrb.mxu0 %v685_v44  ;;  %v694_v44 = vld [vmem:[#allocation4 + $0xe80] sm:$0xff] }
 0x1ba   :  { %394 = vmatpush.msrb.mxu3 %v191_v62  ;;  %827 = vmatpush.msra.mxu1 %v538_v14  ;;  %v504_v62 = vld [vmem:[#allocation4 + $0x890] sm:$0xff]  ;;  %v757_v14 = vld [vmem:[#allocation4 + $0x1078] sm:$0xff] }
 0x1bb   :  { %843 = vmatpush.msrb.mxu0 %v678_v46  ;;  %v512_v46 = vld [vmem:[#allocation4 + $0x8d0] sm:$0xff] }
 0x1bc   :  { %395 = vmatpush.msrb.mxu3 %v187_v1  ;;  %912 = vmatpush.msrb.mxu1 %v756_v16  ;;  %v490_v1 = vld [vmem:[#allocation4 + $0x820] sm:$0xff] }
 0x1bd   :  { %844 = vmatpush.msrb.mxu0 %v671_v48  ;;  %v513_v48 = vld [vmem:[#allocation4 + $0x8d8] sm:$0xff] }
 0x1be   :  { %396 = vmatpush.msrb.mxu3 %v183_v4  ;;  %913 = vmatpush.msrb.mxu1 %v749_v18 }
 0x1bf   :  { %845 = vmatpush.msrb.mxu0 %v664_v51  ;;  %v506_v51 = vld [vmem:[#allocation4 + $0x8a0] sm:$0xff] }
 0x1c0   :  { %397 = vmatpush.msrb.mxu3 %v179_v7  ;;  %914 = vmatpush.msrb.mxu1 %v742_v21  ;;  %v469_v7 = vld [vmem:[#allocation4 + $0x778] sm:$0xff] }
 0x1c1   :  { %398 = vmatmul.f32.vlgmr.msrb.gmra.mxu3 %v1558_v19  ;;  %v602_v19 = vld [vmem:[#allocation4 + $0xba0] sm:$0xff]  ;;  %846 = vmatpush.msrb.mxu0 %v657_v54  ;;  %v499_v54 = vld [vmem:[#allocation4 + $0x868] sm:$0xff] }
 0x1c2   :  { %898 = vmatpush.msra.mxu2 %v602_v19  ;;  %915 = vmatpush.msrb.mxu1 %v735_v22  ;;  %v743_v19 = vld [vmem:[#allocation4 + $0x1008] sm:$0xff]  ;;  %v441_v22 = vld [vmem:[#allocation4 + $0x698] sm:$0xff] }
 0x1c3   :  { %867 = vmatpush.msra.mxu3 %v762_v50  ;;  %847 = vmatpush.msrb.mxu0 %v650_v57  ;;  %v680_v50 = vld [vmem:[#allocation4 + $0xe10] sm:$0xff] }
 0x1c4   :  { %899 = vmatpush.msra.mxu2 %v595_v23  ;;  %916 = vmatpush.msrb.mxu1 %v728_v28  ;;  %v434_v28 = vld [vmem:[#allocation4 + $0x660] sm:$0xff]  ;;  %v492_v57 = vld [vmem:[#allocation4 + $0x830] sm:$0xff] }
 0x1c5   :  { %872 = vmatpush.msrb.mxu3 %v532_v52  ;;  %947 = vmatpush.msra.mxu0 %v763_v60  ;;  %v498_v52 = vld [vmem:[#allocation4 + $0x860] sm:$0xff]  ;;  %v485_v60 = vld [vmem:[#allocation4 + $0x7f8] sm:$0xff] }
 0x1c6   :  { %900 = vmatpush.msra.mxu2 %v588_v24  ;;  %917 = vmatpush.msrb.mxu1 %v721_v31  ;;  %v253_v24 = vperm.slane %v1568_v0, 2 }
 0x1c7   :  { %873 = vmatpush.msrb.mxu3 %v525_v55  ;;  %v491_v55 = vld [vmem:[#allocation4 + $0x828] sm:$0xff] }
 0x1c8   :  { %901 = vmatpush.msra.mxu2 %v581_v25  ;;  %918 = vmatpush.msrb.mxu1 %v714_v34  ;;  %v736_v25 = vld [vmem:[#allocation4 + $0xfd0] sm:$0xff] }
 0x1c9   :  { %874 = vmatpush.msrb.mxu3 %v518_v58  ;;  %v484_v58 = vld [vmem:[#allocation4 + $0x7f0] sm:$0xff] }
 0x1ca   :  { %902 = vmatpush.msra.mxu2 %v574_v26  ;;  %919 = vmatpush.msrb.mxu1 %v707_v37  ;;  %v764_v26 = vld [vmem:[#allocation4 + $0x10b0] sm:$0xff]  ;;  %v533_v37 = vld [vmem:[#allocation4 + $0x978] sm:$0xff] }
 0x1cb   :  { %875 = vmatpush.msrb.mxu3 %v511_v61  ;;  %v477_v61 = vld [vmem:[#allocation4 + $0x7b8] sm:$0xff] }
 0x1cc   :  { %903 = vmatpush.msra.mxu2 %v567_v29  ;;  %920 = vmatpush.msrb.mxu1 %v700_v40  ;;  %v729_v29 = vld [vmem:[#allocation4 + $0xf98] sm:$0xff]  ;;  %v526_v40 = vld [vmem:[#allocation4 + $0x940] sm:$0xff] }
 0x1cd   :  { %876 = vmatpush.msrb.mxu3 %v504_v62  ;;  %v652_v62 = vld [vmem:[#allocation4 + $0xd30] sm:$0xff] }
 0x1ce   :  { %904 = vmatpush.msra.mxu2 %v560_v32  ;;  %921 = vmatpush.msrb.mxu1 %v693_v43  ;;  %v722_v32 = vld [vmem:[#allocation4 + $0xf60] sm:$0xff]  ;;  %v519_v43 = vld [vmem:[#allocation4 + $0x908] sm:$0xff] }
 0x1cf   :  { %877 = vmatpush.msrb.mxu3 %v497_v63  ;;  %v478_v63 = vld [vmem:[#allocation4 + $0x7c0] sm:$0xff] }
 0x1d0   :  { %905 = vmatpush.msra.mxu2 %v553_v35  ;;  %922 = vmatpush.msrb.mxu1 %v686_v45  ;;  %v715_v35 = vld [vmem:[#allocation4 + $0xf28] sm:$0xff]  ;;  %v520_v45 = vld [vmem:[#allocation4 + $0x910] sm:$0xff] }
 0x1d1   :  { %878 = vmatpush.msrb.mxu3 %v490_v1  ;;  %v765_v1 = vld [vmem:[#allocation4 + $0x10b8] sm:$0xff] }
 0x1d2   :  { %906 = vmatpush.msra.mxu2 %v546_v38  ;;  %923 = vmatpush.msrb.mxu1 %v679_v47  ;;  %v708_v38 = vld [vmem:[#allocation4 + $0xef0] sm:$0xff]  ;;  %v687_v47 = vld [vmem:[#allocation4 + $0xe48] sm:$0xff] }
 0x1d3   :  { %879 = vmatpush.msrb.mxu3 %v483_v3  ;;  %v470_v3 = vld [vmem:[#allocation4 + $0x780] sm:$0xff] }
 0x1d4   :  { %907 = vmatpush.msra.mxu2 %v539_v41  ;;  %924 = vmatpush.msrb.mxu1 %v672_v49  ;;  %v701_v41 = vld [vmem:[#allocation4 + $0xeb8] sm:$0xff] }
 0x1d5   :  { %880 = vmatpush.msrb.mxu3 %v476_v5  ;;  %v505_v49 = vld [vmem:[#allocation4 + $0x898] sm:$0xff]  ;;  %v535_v5 = vld [vmem:[#allocation4 + $0x988] sm:$0xff] }
 0x1d6   :  { %925 = vmatpush.msrb.mxu1 %v665_v53  ;;  %v673_v53 = vld [vmem:[#allocation4 + $0xdd8] sm:$0xff] }
 0x1d7   :  { %881 = vmatpush.msrb.mxu3 %v469_v7 }
 0x1d8   :  { %926 = vmatpush.msrb.mxu1 %v658_v56  ;;  %v666_v56 = vld [vmem:[#allocation4 + $0xda0] sm:$0xff] }
 0x1d9   :  { %882 = vmatpush.msrb.mxu3 %v462_v11  ;;  %v456_v11 = vld [vmem:[#allocation4 + $0x710] sm:$0xff] }
 0x1da   :  { %927 = vmatpush.msrb.mxu1 %v651_v59  ;;  %v659_v59 = vld [vmem:[#allocation4 + $0xd68] sm:$0xff] }
 0x1db   :  { %883 = vmatpush.msrb.mxu3 %v455_v15 }
 0x1dd   :  { %884 = vmatpush.msrb.mxu3 %v448_v20 }
 0x1df   :  { %885 = vmatpush.msrb.mxu3 %v441_v22  ;;  %v443_v22 = vld [vmem:[#allocation4 + $0x6a8] sm:$0xff] }
 0x1e1   :  { %886 = vmatpush.msrb.mxu3 %v434_v28  ;;  %v500_v28 = vld [vmem:[#allocation4 + $0x870] sm:$0xff] }
 0x1e3   :  { %887 = vmatpush.msrb.mxu3 %v427_v30  ;;  %v428_v30 = vld [vmem:[#allocation4 + $0x630] sm:$0xff] }
 0x218   :  { %v279_v4 = vpop.f32.mrf.mxu1 }
 0x219   :  { %v280_v6 = vadd.f32 %v279_v4, %v251_v2  ;;  %v254_v2 = vperm.slane %v1568_v0, 3  ;;  %v471_v4 = vld [vmem:[#allocation4 + $0x788] sm:$0xff]  ;;  %v457_v0 = vld [vmem:[#allocation4 + $0x718] sm:$0xff] }
 0x21e   :  { %v299_v8 = vpop.f32.mrf.mxu0  ;;  %v319_v12 = vpop.f32.mrf.mxu2 }
 0x21f   :  { %v300_v9 = vadd.f32 %v299_v8, %v280_v6  ;;  %v320_v16 = vadd.f32 %v319_v12, %v252_v10  ;;  %v463_v6 = vld [vmem:[#allocation4 + $0x748] sm:$0xff]  ;;  %v464_v8 = vld [vmem:[#allocation4 + $0x750] sm:$0xff] }
 0x220   :  { %v419_v12 = vpop.f32.mrf.mxu1 }
 0x221   :  { %v1572_v13 = vmax.f32 %v300_v9, 0.0  ;;  %v528_v9 = vld [vmem:[#allocation4 + $0x950] sm:$0xff] }
 0x223   :  { %808 = vmatmul.f32.vlgmr.msrb.gmra.mxu2 %v1572_v13 }
 0x224   :  { %992 = vmatpush.msrb.mxu2 %v757_v14  ;;  %v339_v18 = vpop.f32.mrf.mxu3  ;;  %v521_v14 = vld [vmem:[#allocation4 + $0x918] sm:$0xff] }
 0x225   :  { %v340_v21 = vadd.f32 %v339_v18, %v320_v16  ;;  %v449_v16 = vld [vmem:[#allocation4 + $0x6d8] sm:$0xff]  ;;  %v514_v18 = vld [vmem:[#allocation4 + $0x8e0] sm:$0xff] }
 0x226   :  { %993 = vmatpush.msrb.mxu2 %v750_v17  ;;  %v359_v27 = vpop.f32.mrf.mxu0  ;;  %v450_v17 = vld [vmem:[#allocation4 + $0x6e0] sm:$0xff] }
 0x227   :  { %v1575_v23 = vmax.f32 %v340_v21, 0.0  ;;  %v360_v31 = vadd.f32 %v359_v27, %v253_v24  ;;  %v645_v21 = vld [vmem:[#allocation4 + $0xcf8] sm:$0xff]  ;;  %v507_v24 = vld [vmem:[#allocation4 + $0x8a8] sm:$0xff]  ;;  %v436_v27 = vld [vmem:[#allocation4 + $0x670] sm:$0xff] }
 0x228   :  { %994 = vmatpush.msrb.mxu2 %v743_v19  ;;  %v442_v19 = vld [vmem:[#allocation4 + $0x6a0] sm:$0xff] }
 0x229   :  { %828 = vmatmul.f32.vlgmr.msra.gmra.mxu1 %v1575_v23 }
 0x22a   :  { %995 = vmatpush.msrb.mxu2 %v736_v25  ;;  %1027 = vmatpush.msra.mxu1 %v764_v26  ;;  %v638_v25 = vld [vmem:[#allocation4 + $0xcc0] sm:$0xff]  ;;  %v435_v26 = vld [vmem:[#allocation4 + $0x668] sm:$0xff] }
 0x22b   :  { %908 = vmatmul.f32.vlgmr.msra.gmra.mxu2 %v1575_v23 }
 0x22c   :  { %996 = vmatpush.msrb.mxu2 %v729_v29  ;;  %v379_v33 = vpop.f32.mrf.mxu3  ;;  %v631_v29 = vld [vmem:[#allocation4 + $0xc88] sm:$0xff] }
 0x22d   :  { %v380_v34 = vadd.f32 %v379_v33, %v360_v31  ;;  %v429_v31 = vld [vmem:[#allocation4 + $0x638] sm:$0xff]  ;;  %v624_v33 = vld [vmem:[#allocation4 + $0xc50] sm:$0xff] }
 0x22e   :  { %997 = vmatpush.msrb.mxu2 %v722_v32  ;;  %v493_v32 = vld [vmem:[#allocation4 + $0x838] sm:$0xff] }
 0x22f   :  { %v1580_v36 = vmax.f32 %v380_v34, 0.0  ;;  %v646_v34 = vld [vmem:[#allocation4 + $0xd00] sm:$0xff] }
 0x230   :  { %998 = vmatpush.msrb.mxu2 %v715_v35  ;;  %v647_v35 = vld [vmem:[#allocation4 + $0xd08] sm:$0xff] }
 0x231   :  { %848 = vmatmul.f32.vlgmr.msrb.gmra.mxu0 %v1580_v36  ;;  %928 = vmatmul.f32.vlgmr.msrb.gmra.mxu1 %v1580_v36 }
 0x232   :  { %952 = vmatpush.msrb.mxu0 %v533_v37  ;;  %999 = vmatpush.msrb.mxu2 %v708_v38  ;;  %v486_v37 = vld [vmem:[#allocation4 + $0x800] sm:$0xff]  ;;  %v617_v38 = vld [vmem:[#allocation4 + $0xc18] sm:$0xff] }
 0x233   :  { %1032 = vmatpush.msrb.mxu1 %v534_v39  ;;  %v639_v39 = vld [vmem:[#allocation4 + $0xcc8] sm:$0xff] }
 0x234   :  { %953 = vmatpush.msrb.mxu0 %v526_v40  ;;  %1000 = vmatpush.msrb.mxu2 %v701_v41  ;;  %v640_v40 = vld [vmem:[#allocation4 + $0xcd0] sm:$0xff]  ;;  %v479_v41 = vld [vmem:[#allocation4 + $0x7c8] sm:$0xff] }
 0x235   :  { %1033 = vmatpush.msrb.mxu1 %v527_v42  ;;  %v610_v42 = vld [vmem:[#allocation4 + $0xbe0] sm:$0xff] }
 0x236   :  { %954 = vmatpush.msrb.mxu0 %v519_v43  ;;  %1001 = vmatpush.msrb.mxu2 %v694_v44  ;;  %v632_v43 = vld [vmem:[#allocation4 + $0xc90] sm:$0xff]  ;;  %v633_v44 = vld [vmem:[#allocation4 + $0xc98] sm:$0xff] }
 0x237   :  { %1034 = vmatpush.msrb.mxu1 %v520_v45  ;;  %v472_v45 = vld [vmem:[#allocation4 + $0x790] sm:$0xff] }
 0x238   :  { %955 = vmatpush.msrb.mxu0 %v512_v46  ;;  %1002 = vmatpush.msrb.mxu2 %v687_v47  ;;  %v603_v46 = vld [vmem:[#allocation4 + $0xba8] sm:$0xff]  ;;  %v625_v47 = vld [vmem:[#allocation4 + $0xc58] sm:$0xff] }
 0x239   :  { %1035 = vmatpush.msrb.mxu1 %v513_v48  ;;  %v626_v48 = vld [vmem:[#allocation4 + $0xc60] sm:$0xff] }
 0x23a   :  { %956 = vmatpush.msrb.mxu0 %v505_v49  ;;  %1003 = vmatpush.msrb.mxu2 %v680_v50  ;;  %v465_v49 = vld [vmem:[#allocation4 + $0x758] sm:$0xff]  ;;  %v596_v50 = vld [vmem:[#allocation4 + $0xb70] sm:$0xff] }
 0x23b   :  { %1036 = vmatpush.msrb.mxu1 %v506_v51  ;;  %v618_v51 = vld [vmem:[#allocation4 + $0xc20] sm:$0xff] }
 0x23c   :  { %957 = vmatpush.msrb.mxu0 %v498_v52  ;;  %1004 = vmatpush.msrb.mxu2 %v673_v53  ;;  %v619_v52 = vld [vmem:[#allocation4 + $0xc28] sm:$0xff]  ;;  %v458_v53 = vld [vmem:[#allocation4 + $0x720] sm:$0xff] }
 0x23d   :  { %1037 = vmatpush.msrb.mxu1 %v499_v54  ;;  %v589_v54 = vld [vmem:[#allocation4 + $0xb38] sm:$0xff] }
 0x23e   :  { %958 = vmatpush.msrb.mxu0 %v491_v55  ;;  %1005 = vmatpush.msrb.mxu2 %v666_v56  ;;  %v611_v55 = vld [vmem:[#allocation4 + $0xbe8] sm:$0xff]  ;;  %v612_v56 = vld [vmem:[#allocation4 + $0xbf0] sm:$0xff] }
 0x23f   :  { %1038 = vmatpush.msrb.mxu1 %v492_v57  ;;  %v451_v57 = vld [vmem:[#allocation4 + $0x6e8] sm:$0xff] }
 0x240   :  { %959 = vmatpush.msrb.mxu0 %v484_v58  ;;  %1006 = vmatpush.msrb.mxu2 %v659_v59  ;;  %v582_v58 = vld [vmem:[#allocation4 + $0xb00] sm:$0xff]  ;;  %v604_v59 = vld [vmem:[#allocation4 + $0xbb0] sm:$0xff] }
 0x241   :  { %1039 = vmatpush.msrb.mxu1 %v485_v60  ;;  %v605_v60 = vld [vmem:[#allocation4 + $0xbb8] sm:$0xff] }
 0x242   :  { %960 = vmatpush.msrb.mxu0 %v477_v61  ;;  %1007 = vmatpush.msrb.mxu2 %v652_v62  ;;  %v444_v61 = vld [vmem:[#allocation4 + $0x6b0] sm:$0xff]  ;;  %v575_v62 = vld [vmem:[#allocation4 + $0xac8] sm:$0xff] }
 0x243   :  { %1040 = vmatpush.msrb.mxu1 %v478_v63  ;;  %1008 = vmatmul.f32.vlgmr.msrb.gmra.mxu2 %v1580_v36  ;;  %v597_v63 = vld [vmem:[#allocation4 + $0xb78] sm:$0xff] }
 0x244   :  { %1107 = vmatpush.msra.mxu2 %v765_v1  ;;  %v399_v7 = vpop.f32.mrf.mxu3  ;;  %961 = vmatpush.msrb.mxu0 %v470_v3  ;;  %v598_v1 = vld [vmem:[#allocation4 + $0xb80] sm:$0xff]  ;;  %v568_v3 = vld [vmem:[#allocation4 + $0xa90] sm:$0xff] }
 0x245   :  { %v400_v10 = vadd.f32 %v399_v7, %v254_v2  ;;  %1041 = vmatpush.msrb.mxu1 %v471_v4  ;;  %v437_v2 = vld [vmem:[#allocation4 + $0x678] sm:$0xff]  ;;  %v590_v4 = vld [vmem:[#allocation4 + $0xb40] sm:$0xff] }
 0x246   :  { %1112 = vmatpush.msrb.mxu2 %v535_v5  ;;  %962 = vmatpush.msrb.mxu0 %v463_v6  ;;  %v591_v5 = vld [vmem:[#allocation4 + $0xb48] sm:$0xff]  ;;  %v430_v6 = vld [vmem:[#allocation4 + $0x640] sm:$0xff]  ;;  %v561_v7 = vld [vmem:[#allocation4 + $0xa58] sm:$0xff] }
 0x247   :  { %v420_v15 = vadd.f32 %v419_v12, %v400_v10  ;;  %1042 = vmatpush.msrb.mxu1 %v464_v8  ;;  %v583_v8 = vld [vmem:[#allocation4 + $0xb08] sm:$0xff]  ;;  %v648_v10 = vld [vmem:[#allocation4 + $0xd10] sm:$0xff] }
 0x248   :  { %1113 = vmatpush.msrb.mxu2 %v528_v9  ;;  %963 = vmatpush.msrb.mxu0 %v456_v11  ;;  %v584_v9 = vld [vmem:[#allocation4 + $0xb10] sm:$0xff]  ;;  %v554_v11 = vld [vmem:[#allocation4 + $0xa20] sm:$0xff] }
 0x249   :  { %v1586_v20 = vmax.f32 %v420_v15, 0.0  ;;  %1043 = vmatpush.msrb.mxu1 %v457_v0  ;;  %v576_v12 = vld [vmem:[#allocation4 + $0xad0] sm:$0xff]  ;;  %v577_v0 = vld [vmem:[#allocation4 + $0xad8] sm:$0xff]  ;;  %v547_v15 = vld [vmem:[#allocation4 + $0x9e8] sm:$0xff] }
 0x24a   :  { %1114 = vmatpush.msrb.mxu2 %v521_v14  ;;  %964 = vmatpush.msrb.mxu0 %v449_v16  ;;  %v641_v14 = vld [vmem:[#allocation4 + $0xcd8] sm:$0xff] }
 0x24b   :  { %1044 = vmatpush.msrb.mxu1 %v450_v17  ;;  %1418 = vmatmul.msk.f32.vlgmr.msra.gmra.mxu3 %vm788_vm2, %v1586_v20  ;;  %v569_v16 = vld [vmem:[#allocation4 + $0xa98] sm:$0xff]  ;;  %v570_v17 = vld [vmem:[#allocation4 + $0xaa0] sm:$0xff] }
 0x24c   :  { %1115 = vmatpush.msrb.mxu2 %v514_v18  ;;  %1419 = vmatmul.msk.f32.vlgmr.msra.gmra.mxu0 %vm788_vm2, %v1586_v20  ;;  %v634_v18 = vld [vmem:[#allocation4 + $0xca0] sm:$0xff] }
 0x24d   :  { %972 = vmatpush.msra.mxu3 %v645_v21  ;;  %1420 = vmatmul.msk.f32.vlgmr.msra.gmra.mxu1 %vm788_vm2, %v1586_v20  ;;  %v540_v21 = vld [vmem:[#allocation4 + $0x9b0] sm:$0xff] }
 0x24e   :  { %1421 = vmatmul.msk.f32.vlgmr.msra.gmra.mxu2 %vm788_vm2, %v1586_v20  ;;  %965 = vmatpush.msrb.mxu0 %v442_v19  ;;  %v562_v19 = vld [vmem:[#allocation4 + $0xa60] sm:$0xff] }
 0x24f   :  { %1045 = vmatpush.msrb.mxu1 %v443_v22  ;;  %1116 = vmatpush.msrb.mxu2 %v507_v24  ;;  %v563_v22 = vld [vmem:[#allocation4 + $0xa68] sm:$0xff] }
 0x250   :  { %973 = vmatpush.msra.mxu3 %v638_v25  ;;  %966 = vmatpush.msrb.mxu0 %v435_v26  ;;  %v627_v24 = vld [vmem:[#allocation4 + $0xc68] sm:$0xff]  ;;  %v758_v26 = vld [vmem:[#allocation4 + $0x1080] sm:$0xff] }
 0x251   :  { %1046 = vmatpush.msrb.mxu1 %v436_v27  ;;  %1117 = vmatpush.msrb.mxu2 %v500_v28  ;;  %v555_v25 = vld [vmem:[#allocation4 + $0xa28] sm:$0xff]  ;;  %v556_v27 = vld [vmem:[#allocation4 + $0xa30] sm:$0xff] }
 0x252   :  { %974 = vmatpush.msra.mxu3 %v631_v29  ;;  %967 = vmatpush.msrb.mxu0 %v428_v30  ;;  %v620_v28 = vld [vmem:[#allocation4 + $0xc30] sm:$0xff]  ;;  %v751_v30 = vld [vmem:[#allocation4 + $0x1048] sm:$0xff] }
 0x253   :  { %1047 = vmatpush.msrb.mxu1 %v429_v31  ;;  %1118 = vmatpush.msrb.mxu2 %v493_v32  ;;  %v548_v29 = vld [vmem:[#allocation4 + $0x9f0] sm:$0xff]  ;;  %v549_v31 = vld [vmem:[#allocation4 + $0x9f8] sm:$0xff] }
 0x254   :  { %975 = vmatpush.msra.mxu3 %v624_v33  ;;  %1052 = vmatpush.msra.mxu0 %v646_v34  ;;  %v613_v32 = vld [vmem:[#allocation4 + $0xbf8] sm:$0xff]  ;;  %v744_v34 = vld [vmem:[#allocation4 + $0x1010] sm:$0xff] }
 0x255   :  { %1132 = vmatpush.msra.mxu1 %v647_v35  ;;  %1119 = vmatpush.msrb.mxu2 %v486_v37  ;;  %v541_v33 = vld [vmem:[#allocation4 + $0x9b8] sm:$0xff]  ;;  %v542_v35 = vld [vmem:[#allocation4 + $0x9c0] sm:$0xff] }
 0x256   :  { %888 = vmatmul.f32.vlgmr.msrb.gmra.mxu3 %v1572_v13  ;;  %968 = vmatmul.f32.vlgmr.msrb.gmra.mxu0 %v1572_v13  ;;  %v606_v37 = vld [vmem:[#allocation4 + $0xbc0] sm:$0xff] }
 0x257   :  { %976 = vmatpush.msra.mxu3 %v617_v38  ;;  %1048 = vmatmul.f32.vlgmr.msrb.gmra.mxu1 %v1572_v13  ;;  %v737_v38 = vld [vmem:[#allocation4 + $0xfd8] sm:$0xff] }
 0x258   :  { %1053 = vmatpush.msra.mxu0 %v639_v39  ;;  %1133 = vmatpush.msra.mxu1 %v640_v40  ;;  %v759_v39 = vld [vmem:[#allocation4 + $0x1088] sm:$0xff]  ;;  %v760_v40 = vld [vmem:[#allocation4 + $0x1090] sm:$0xff] }
 0x259   :  { %1120 = vmatpush.msrb.mxu2 %v479_v41  ;;  %977 = vmatpush.msra.mxu3 %v610_v42  ;;  %v599_v41 = vld [vmem:[#allocation4 + $0xb88] sm:$0xff]  ;;  %v730_v42 = vld [vmem:[#allocation4 + $0xfa0] sm:$0xff] }
 0x25a   :  { %1054 = vmatpush.msra.mxu0 %v632_v43  ;;  %1134 = vmatpush.msra.mxu1 %v633_v44  ;;  %v752_v43 = vld [vmem:[#allocation4 + $0x1050] sm:$0xff]  ;;  %v753_v44 = vld [vmem:[#allocation4 + $0x1058] sm:$0xff] }
 0x25b   :  { %1121 = vmatpush.msrb.mxu2 %v472_v45  ;;  %978 = vmatpush.msra.mxu3 %v603_v46  ;;  %v592_v45 = vld [vmem:[#allocation4 + $0xb50] sm:$0xff]  ;;  %v723_v46 = vld [vmem:[#allocation4 + $0xf68] sm:$0xff] }
 0x25c   :  { %1055 = vmatpush.msra.mxu0 %v625_v47  ;;  %1135 = vmatpush.msra.mxu1 %v626_v48  ;;  %v745_v47 = vld [vmem:[#allocation4 + $0x1018] sm:$0xff]  ;;  %v746_v48 = vld [vmem:[#allocation4 + $0x1020] sm:$0xff] }
 0x25d   :  { %1122 = vmatpush.msrb.mxu2 %v465_v49  ;;  %979 = vmatpush.msra.mxu3 %v596_v50  ;;  %v585_v49 = vld [vmem:[#allocation4 + $0xb18] sm:$0xff]  ;;  %v716_v50 = vld [vmem:[#allocation4 + $0xf30] sm:$0xff] }
 0x25e   :  { %1056 = vmatpush.msra.mxu0 %v618_v51  ;;  %1136 = vmatpush.msra.mxu1 %v619_v52  ;;  %v738_v51 = vld [vmem:[#allocation4 + $0xfe0] sm:$0xff]  ;;  %v739_v52 = vld [vmem:[#allocation4 + $0xfe8] sm:$0xff] }
 0x25f   :  { %1123 = vmatpush.msrb.mxu2 %v458_v53  ;;  %980 = vmatpush.msra.mxu3 %v589_v54  ;;  %v578_v53 = vld [vmem:[#allocation4 + $0xae0] sm:$0xff]  ;;  %v709_v54 = vld [vmem:[#allocation4 + $0xef8] sm:$0xff] }
 0x260   :  { %1057 = vmatpush.msra.mxu0 %v611_v55  ;;  %1137 = vmatpush.msra.mxu1 %v612_v56  ;;  %v731_v55 = vld [vmem:[#allocation4 + $0xfa8] sm:$0xff]  ;;  %v732_v56 = vld [vmem:[#allocation4 + $0xfb0] sm:$0xff] }
 0x261   :  { %1124 = vmatpush.msrb.mxu2 %v451_v57  ;;  %981 = vmatpush.msra.mxu3 %v582_v58  ;;  %v571_v57 = vld [vmem:[#allocation4 + $0xaa8] sm:$0xff]  ;;  %v702_v58 = vld [vmem:[#allocation4 + $0xec0] sm:$0xff] }
 0x262   :  { %1058 = vmatpush.msra.mxu0 %v604_v59  ;;  %1138 = vmatpush.msra.mxu1 %v605_v60  ;;  %v724_v59 = vld [vmem:[#allocation4 + $0xf70] sm:$0xff]  ;;  %v725_v60 = vld [vmem:[#allocation4 + $0xf78] sm:$0xff] }
 0x263   :  { %1125 = vmatpush.msrb.mxu2 %v444_v61  ;;  %982 = vmatpush.msra.mxu3 %v575_v62  ;;  %v564_v61 = vld [vmem:[#allocation4 + $0xa70] sm:$0xff]  ;;  %v695_v62 = vld [vmem:[#allocation4 + $0xe88] sm:$0xff] }
 0x264   :  { %1059 = vmatpush.msra.mxu0 %v597_v63  ;;  %1139 = vmatpush.msra.mxu1 %v598_v1  ;;  %v717_v63 = vld [vmem:[#allocation4 + $0xf38] sm:$0xff]  ;;  %v718_v1 = vld [vmem:[#allocation4 + $0xf40] sm:$0xff] }
 0x265   :  { %1126 = vmatpush.msrb.mxu2 %v437_v2  ;;  %983 = vmatpush.msra.mxu3 %v568_v3  ;;  %v557_v2 = vld [vmem:[#allocation4 + $0xa38] sm:$0xff]  ;;  %v688_v3 = vld [vmem:[#allocation4 + $0xe50] sm:$0xff] }
 0x266   :  { %1060 = vmatpush.msra.mxu0 %v590_v4  ;;  %1140 = vmatpush.msra.mxu1 %v591_v5  ;;  %v710_v4 = vld [vmem:[#allocation4 + $0xf00] sm:$0xff]  ;;  %v711_v5 = vld [vmem:[#allocation4 + $0xf08] sm:$0xff] }
 0x267   :  { %1127 = vmatpush.msrb.mxu2 %v430_v6  ;;  %984 = vmatpush.msra.mxu3 %v561_v7  ;;  %v550_v6 = vld [vmem:[#allocation4 + $0xa00] sm:$0xff]  ;;  %v681_v7 = vld [vmem:[#allocation4 + $0xe18] sm:$0xff] }
 0x268   :  { %1061 = vmatpush.msra.mxu0 %v583_v8  ;;  %1128 = vmatmul.f32.vlgmr.msrb.gmra.mxu2 %v1572_v13  ;;  %v703_v8 = vld [vmem:[#allocation4 + $0xec8] sm:$0xff] }
 0x269   :  { %1141 = vmatpush.msra.mxu1 %v584_v9  ;;  %1212 = vmatpush.msra.mxu2 %v648_v10  ;;  %v704_v9 = vld [vmem:[#allocation4 + $0xed0] sm:$0xff]  ;;  %v543_v10 = vld [vmem:[#allocation4 + $0x9c8] sm:$0xff] }
 0x26a   :  { %985 = vmatpush.msra.mxu3 %v554_v11  ;;  %1062 = vmatpush.msra.mxu0 %v576_v12  ;;  %v674_v11 = vld [vmem:[#allocation4 + $0xde0] sm:$0xff]  ;;  %v696_v12 = vld [vmem:[#allocation4 + $0xe90] sm:$0xff] }
 0x26b   :  { %1142 = vmatpush.msra.mxu1 %v577_v0  ;;  %1213 = vmatpush.msra.mxu2 %v641_v14  ;;  %v697_v0 = vld [vmem:[#allocation4 + $0xe98] sm:$0xff] }
 0x26c   :  { %986 = vmatpush.msra.mxu3 %v547_v15  ;;  %1063 = vmatpush.msra.mxu0 %v569_v16  ;;  %v761_v14 = vld [vmem:[#allocation4 + $0x1098] sm:$0xff]  ;;  %v667_v15 = vld [vmem:[#allocation4 + $0xda8] sm:$0xff] }
 0x26d   :  { %1143 = vmatpush.msra.mxu1 %v570_v17  ;;  %1214 = vmatpush.msra.mxu2 %v634_v18  ;;  %v689_v16 = vld [vmem:[#allocation4 + $0xe58] sm:$0xff]  ;;  %v690_v17 = vld [vmem:[#allocation4 + $0xe60] sm:$0xff] }
 0x26e   :  { %987 = vmatpush.msra.mxu3 %v540_v21  ;;  %1064 = vmatpush.msra.mxu0 %v562_v19  ;;  %v754_v18 = vld [vmem:[#allocation4 + $0x1060] sm:$0xff]  ;;  %v660_v21 = vld [vmem:[#allocation4 + $0xd70] sm:$0xff] }
 0x26f   :  { %1144 = vmatpush.msra.mxu1 %v563_v22  ;;  %1215 = vmatpush.msra.mxu2 %v627_v24  ;;  %v682_v19 = vld [vmem:[#allocation4 + $0xe20] sm:$0xff]  ;;  %v683_v22 = vld [vmem:[#allocation4 + $0xe28] sm:$0xff] }
 0x270   :  { %988 = vmatmul.f32.vlgmr.msra.gmra.mxu3 %v1575_v23  ;;  %1065 = vmatpush.msra.mxu0 %v555_v25  ;;  %v747_v24 = vld [vmem:[#allocation4 + $0x1028] sm:$0xff]  ;;  %v653_v25 = vld [vmem:[#allocation4 + $0xd38] sm:$0xff] }
 0x271   :  { %1072 = vmatpush.msrb.mxu3 %v758_v26  ;;  %1145 = vmatpush.msra.mxu1 %v556_v27  ;;  %v675_v26 = vld [vmem:[#allocation4 + $0xde8] sm:$0xff]  ;;  %v676_v27 = vld [vmem:[#allocation4 + $0xdf0] sm:$0xff] }
 0x272   :  { %1216 = vmatpush.msra.mxu2 %v620_v28  ;;  %1066 = vmatpush.msra.mxu0 %v548_v29  ;;  %v740_v28 = vld [vmem:[#allocation4 + $0xff0] sm:$0xff] }
 0x273   :  { %1073 = vmatpush.msrb.mxu3 %v751_v30  ;;  %1146 = vmatpush.msra.mxu1 %v549_v31  ;;  %v668_v29 = vld [vmem:[#allocation4 + $0xdb0] sm:$0xff]  ;;  %v766_v30 = vld [vmem:[#allocation4 + $0x10c0] sm:$0xff]  ;;  %v669_v31 = vld [vmem:[#allocation4 + $0xdb8] sm:$0xff] }
 0x274   :  { %1217 = vmatpush.msra.mxu2 %v613_v32  ;;  %1067 = vmatpush.msra.mxu0 %v541_v33  ;;  %v536_v32 = vld [vmem:[#allocation4 + $0x990] sm:$0xff]  ;;  %v733_v33 = vld [vmem:[#allocation4 + $0xfb8] sm:$0xff] }
 0x275   :  { %1074 = vmatpush.msrb.mxu3 %v744_v34  ;;  %1147 = vmatpush.msra.mxu1 %v542_v35  ;;  %v661_v34 = vld [vmem:[#allocation4 + $0xd78] sm:$0xff]  ;;  %v662_v35 = vld [vmem:[#allocation4 + $0xd80] sm:$0xff] }
 0x276   :  { %1218 = vmatpush.msra.mxu2 %v606_v37  ;;  %1068 = vmatmul.f32.vlgmr.msra.gmra.mxu0 %v1575_v23  ;;  %v529_v37 = vld [vmem:[#allocation4 + $0x958] sm:$0xff] }
 0x277   :  { %1075 = vmatpush.msrb.mxu3 %v737_v38  ;;  %1148 = vmatmul.f32.vlgmr.msra.gmra.mxu1 %v1575_v23  ;;  %v726_v38 = vld [vmem:[#allocation4 + $0xf80] sm:$0xff] }
 0x278   :  { %1152 = vmatpush.msrb.mxu0 %v759_v39  ;;  %1232 = vmatpush.msrb.mxu1 %v760_v40  ;;  %v654_v39 = vld [vmem:[#allocation4 + $0xd40] sm:$0xff]  ;;  %v655_v40 = vld [vmem:[#allocation4 + $0xd48] sm:$0xff] }
 0x279   :  { %1219 = vmatpush.msra.mxu2 %v599_v41  ;;  %1076 = vmatpush.msrb.mxu3 %v730_v42  ;;  %v522_v41 = vld [vmem:[#allocation4 + $0x920] sm:$0xff]  ;;  %v719_v42 = vld [vmem:[#allocation4 + $0xf48] sm:$0xff] }
 0x27a   :  { %1153 = vmatpush.msrb.mxu0 %v752_v43  ;;  %1233 = vmatpush.msrb.mxu1 %v753_v44  ;;  %v767_v43 = vld [vmem:[#allocation4 + $0x10c8] sm:$0xff] }
 0x27b   :  { %1220 = vmatpush.msra.mxu2 %v592_v45  ;;  %1077 = vmatpush.msrb.mxu3 %v723_v46  ;;  %v515_v44 = vld [vmem:[#allocation4 + $0x8e8] sm:$0xff]  ;;  %v537_v45 = vld [vmem:[#allocation4 + $0x998] sm:$0xff]  ;;  %v712_v46 = vld [vmem:[#allocation4 + $0xf10] sm:$0xff] }
 0x27c   :  { %1154 = vmatpush.msrb.mxu0 %v745_v47  ;;  %1234 = vmatpush.msrb.mxu1 %v746_v48  ;;  %v768_v47 = vld [vmem:[#allocation4 + $0x10d0] sm:$0xff] }
 0x27d   :  { %1221 = vmatpush.msra.mxu2 %v585_v49  ;;  %1078 = vmatpush.msrb.mxu3 %v716_v50  ;;  %v508_v48 = vld [vmem:[#allocation4 + $0x8b0] sm:$0xff]  ;;  %v530_v49 = vld [vmem:[#allocation4 + $0x960] sm:$0xff]  ;;  %v705_v50 = vld [vmem:[#allocation4 + $0xed8] sm:$0xff] }
 0x27e   :  { %1155 = vmatpush.msrb.mxu0 %v738_v51  ;;  %1235 = vmatpush.msrb.mxu1 %v739_v52  ;;  %v501_v51 = vld [vmem:[#allocation4 + $0x878] sm:$0xff]  ;;  %v523_v52 = vld [vmem:[#allocation4 + $0x928] sm:$0xff] }
 0x27f   :  { %1222 = vmatpush.msra.mxu2 %v578_v53  ;;  %1079 = vmatpush.msrb.mxu3 %v709_v54  ;;  %v698_v53 = vld [vmem:[#allocation4 + $0xea0] sm:$0xff] }
 0x280   :  { %1156 = vmatpush.msrb.mxu0 %v731_v55  ;;  %1236 = vmatpush.msrb.mxu1 %v732_v56  ;;  %v494_v54 = vld [vmem:[#allocation4 + $0x840] sm:$0xff]  ;;  %v516_v55 = vld [vmem:[#allocation4 + $0x8f0] sm:$0xff]  ;;  %v691_v56 = vld [vmem:[#allocation4 + $0xe68] sm:$0xff] }
 0x281   :  { %1223 = vmatpush.msra.mxu2 %v571_v57  ;;  %1080 = vmatpush.msrb.mxu3 %v702_v58  ;;  %v487_v57 = vld [vmem:[#allocation4 + $0x808] sm:$0xff]  ;;  %v509_v58 = vld [vmem:[#allocation4 + $0x8b8] sm:$0xff] }
 0x282   :  { %1157 = vmatpush.msrb.mxu0 %v724_v59  ;;  %1237 = vmatpush.msrb.mxu1 %v725_v60  ;;  %v684_v59 = vld [vmem:[#allocation4 + $0xe30] sm:$0xff] }
 0x283   :  { %1224 = vmatpush.msra.mxu2 %v564_v61  ;;  %1081 = vmatpush.msrb.mxu3 %v695_v62  ;;  %v480_v60 = vld [vmem:[#allocation4 + $0x7d0] sm:$0xff]  ;;  %v502_v61 = vld [vmem:[#allocation4 + $0x880] sm:$0xff]  ;;  %v677_v62 = vld [vmem:[#allocation4 + $0xdf8] sm:$0xff] }
 0x284   :  { %1158 = vmatpush.msrb.mxu0 %v717_v63  ;;  %1238 = vmatpush.msrb.mxu1 %v718_v1  ;;  %v473_v63 = vld [vmem:[#allocation4 + $0x798] sm:$0xff]  ;;  %v495_v1 = vld [vmem:[#allocation4 + $0x848] sm:$0xff] }
 0x285   :  { %1225 = vmatpush.msra.mxu2 %v557_v2  ;;  %1082 = vmatpush.msrb.mxu3 %v688_v3  ;;  %v670_v2 = vld [vmem:[#allocation4 + $0xdc0] sm:$0xff] }
 0x286   :  { %1159 = vmatpush.msrb.mxu0 %v710_v4  ;;  %1239 = vmatpush.msrb.mxu1 %v711_v5  ;;  %v466_v3 = vld [vmem:[#allocation4 + $0x760] sm:$0xff]  ;;  %v488_v4 = vld [vmem:[#allocation4 + $0x810] sm:$0xff]  ;;  %v663_v5 = vld [vmem:[#allocation4 + $0xd88] sm:$0xff] }
 0x287   :  { %1226 = vmatpush.msra.mxu2 %v550_v6  ;;  %1083 = vmatpush.msrb.mxu3 %v681_v7  ;;  %v459_v6 = vld [vmem:[#allocation4 + $0x728] sm:$0xff]  ;;  %v656_v7 = vld [vmem:[#allocation4 + $0xd50] sm:$0xff] }
 0x288   :  { %1160 = vmatpush.msrb.mxu0 %v703_v8  ;;  %1240 = vmatpush.msrb.mxu1 %v704_v9  ;;  %v452_v8 = vld [vmem:[#allocation4 + $0x6f0] sm:$0xff]  ;;  %v474_v9 = vld [vmem:[#allocation4 + $0x7a0] sm:$0xff] }
 0x289   :  { %1227 = vmatpush.msra.mxu2 %v543_v10  ;;  %1084 = vmatpush.msrb.mxu3 %v674_v11  ;;  %v445_v10 = vld [vmem:[#allocation4 + $0x6b8] sm:$0xff]  ;;  %v467_v11 = vld [vmem:[#allocation4 + $0x768] sm:$0xff] }
 0x28a   :  { %1161 = vmatpush.msrb.mxu0 %v696_v12  ;;  %1228 = vmatmul.f32.vlgmr.msra.gmra.mxu2 %v1575_v23  ;;  %v438_v12 = vld [vmem:[#allocation4 + $0x680] sm:$0xff] }
 0x28b   :  { %1241 = vmatpush.msrb.mxu1 %v697_v0  ;;  %1312 = vmatpush.msrb.mxu2 %v761_v14  ;;  %v460_v0 = vld [vmem:[#allocation4 + $0x730] sm:$0xff]  ;;  %v431_v14 = vld [vmem:[#allocation4 + $0x648] sm:$0xff] }
 0x28c   :  { %1085 = vmatpush.msrb.mxu3 %v667_v15  ;;  %1162 = vmatpush.msrb.mxu0 %v689_v16  ;;  %v453_v15 = vld [vmem:[#allocation4 + $0x6f8] sm:$0xff] }
 0x28d   :  { %1242 = vmatpush.msrb.mxu1 %v690_v17  ;;  %1313 = vmatpush.msrb.mxu2 %v754_v18  ;;  %v649_v16 = vld [vmem:[#allocation4 + $0xd18] sm:$0xff]  ;;  %v446_v17 = vld [vmem:[#allocation4 + $0x6c0] sm:$0xff] }
 0x28e   :  { %1086 = vmatpush.msrb.mxu3 %v660_v21  ;;  %1163 = vmatpush.msrb.mxu0 %v682_v19  ;;  %v642_v18 = vld [vmem:[#allocation4 + $0xce0] sm:$0xff]  ;;  %v635_v21 = vld [vmem:[#allocation4 + $0xca8] sm:$0xff]  ;;  %v432_v19 = vld [vmem:[#allocation4 + $0x650] sm:$0xff] }
 0x28f   :  { %1243 = vmatpush.msrb.mxu1 %v683_v22  ;;  %1314 = vmatpush.msrb.mxu2 %v747_v24  ;;  %v628_v22 = vld [vmem:[#allocation4 + $0xc70] sm:$0xff]  ;;  %v621_v24 = vld [vmem:[#allocation4 + $0xc38] sm:$0xff] }
 0x290   :  { %1087 = vmatpush.msrb.mxu3 %v653_v25  ;;  %1164 = vmatpush.msrb.mxu0 %v675_v26  ;;  %v614_v25 = vld [vmem:[#allocation4 + $0xc00] sm:$0xff]  ;;  %v607_v26 = vld [vmem:[#allocation4 + $0xbc8] sm:$0xff] }
 0x291   :  { %1244 = vmatpush.msrb.mxu1 %v676_v27  ;;  %1315 = vmatpush.msrb.mxu2 %v740_v28  ;;  %v600_v27 = vld [vmem:[#allocation4 + $0xb90] sm:$0xff]  ;;  %v593_v28 = vld [vmem:[#allocation4 + $0xb58] sm:$0xff] }
 0x292   :  { %1088 = vmatmul.f32.vlgmr.msrb.gmra.mxu3 %v1580_v36  ;;  %1165 = vmatpush.msrb.mxu0 %v668_v29  ;;  %v586_v29 = vld [vmem:[#allocation4 + $0xb20] sm:$0xff] }
 0x293   :  { %1187 = vmatpush.msra.mxu3 %v766_v30  ;;  %1245 = vmatpush.msrb.mxu1 %v669_v31  ;;  %v579_v30 = vld [vmem:[#allocation4 + $0xae8] sm:$0xff]  ;;  %v572_v31 = vld [vmem:[#allocation4 + $0xab0] sm:$0xff] }
 0x294   :  { %1316 = vmatpush.msrb.mxu2 %v733_v33  ;;  %1166 = vmatpush.msrb.mxu0 %v661_v34  ;;  %v558_v33 = vld [vmem:[#allocation4 + $0xa40] sm:$0xff]  ;;  %v544_v34 = vld [vmem:[#allocation4 + $0x9d0] sm:$0xff] }
 0x295   :  { %1192 = vmatpush.msrb.mxu3 %v536_v32  ;;  %1246 = vmatpush.msrb.mxu1 %v662_v35  ;;  %v565_v32 = vld [vmem:[#allocation4 + $0xa78] sm:$0xff] }
 0x296   :  { %1317 = vmatpush.msrb.mxu2 %v726_v38  ;;  %1167 = vmatpush.msrb.mxu0 %v654_v39  ;;  %v770_v39 = vld [vmem:[#allocation6 + $0x4] ss:$8 sm:$0xf] }
 0x297   :  { %1193 = vmatpush.msrb.mxu3 %v529_v37  ;;  %1247 = vmatpush.msrb.mxu1 %v655_v40  ;;  %v771_v40 = vld [vmem:[#allocation6 + $0x4] ss:$8 sm:$0xf0] }
 0x298   :  { %1318 = vmatpush.msrb.mxu2 %v719_v42  ;;  %1168 = vmatmul.f32.vlgmr.msrb.gmra.mxu0 %v1580_v36 }
 0x299   :  { %1194 = vmatpush.msrb.mxu3 %v522_v41  ;;  %1248 = vmatmul.f32.vlgmr.msrb.gmra.mxu1 %v1580_v36 }
 0x29a   :  { %1267 = vmatpush.msra.mxu0 %v767_v43  ;;  %1319 = vmatpush.msrb.mxu2 %v712_v46  ;;  %v1617_v43 = vor.u32 %v771_v40, %v770_v39 }
 0x29b   :  { %1195 = vmatpush.msrb.mxu3 %v515_v44  ;;  %1347 = vmatpush.msra.mxu1 %v768_v47 }
 0x29c   :  { %1272 = vmatpush.msrb.mxu0 %v537_v45  ;;  %1422 = vmatmul.msk.f32.vlgmr.msra.gmra.mxu3 %vm788_vm2, %v1586_v20  ;;  %v775_v45 = vperm.slane %v1617_v43, 1  ;;  %v776_v47 = vperm.slane %v1617_v43, 2 }
 0x29d   :  { %1196 = vmatpush.msrb.mxu3 %v508_v48  ;;  %1320 = vmatpush.msrb.mxu2 %v705_v50 }
 0x29e   :  { %1273 = vmatpush.msrb.mxu0 %v530_v49 }
 0x29f   :  { %1197 = vmatpush.msrb.mxu3 %v501_v51  ;;  %1321 = vmatpush.msrb.mxu2 %v698_v53 }
 0x2a0   :  { %1274 = vmatpush.msrb.mxu0 %v523_v52 }
 0x2a1   :  { %1198 = vmatpush.msrb.mxu3 %v494_v54  ;;  %1322 = vmatpush.msrb.mxu2 %v691_v56  ;;  %v774_v54 = vperm.slane %v1617_v43, 0 }
 0x2a2   :  { %1275 = vmatpush.msrb.mxu0 %v516_v55  ;;  %1424 = vmatmul.msk.f32.vlgmr.msra.gmra.mxu1 %vm788_vm2, %v1586_v20 }
 0x2a3   :  { %1423 = vmatmul.msk.f32.vlgmr.msra.gmra.mxu0 %vm788_vm2, %v1586_v20  ;;  %1199 = vmatpush.msrb.mxu3 %v487_v57  ;;  %v481_v20 = vld [vmem:[#allocation4 + $0x7d8] sm:$0xff] }
 0x2a4   :  { %1276 = vmatpush.msrb.mxu0 %v509_v58  ;;  %1323 = vmatpush.msrb.mxu2 %v684_v59 }
 0x2a5   :  { %1200 = vmatpush.msrb.mxu3 %v480_v60 }
 0x2a6   :  { %1277 = vmatpush.msrb.mxu0 %v502_v61  ;;  %1324 = vmatpush.msrb.mxu2 %v677_v62  ;;  %v829_v38 = vpop.f32.mrf.mxu1  ;;  %v809_v41 = vpop.f32.mrf.mxu2  ;;  %v777_v62 = vperm.slane %v1617_v43, 3 }
 0x2a7   :  { %1201 = vmatpush.msrb.mxu3 %v473_v63  ;;  %v810_v58 = vadd.f32 %v809_v41, %v774_v54 }
 0x2a8   :  { %1278 = vmatpush.msrb.mxu0 %v495_v1  ;;  %1325 = vmatpush.msrb.mxu2 %v670_v2 }
 0x2a9   :  { %1202 = vmatpush.msrb.mxu3 %v466_v3  ;;  %v830_v61 = vadd.f32 %v829_v38, %v810_v58 }
 0x2aa   :  { %1279 = vmatpush.msrb.mxu0 %v488_v4  ;;  %1326 = vmatpush.msrb.mxu2 %v663_v5 }
 0x2ab   :  { %1203 = vmatpush.msrb.mxu3 %v459_v6 }
 0x2ac   :  { %1280 = vmatpush.msrb.mxu0 %v481_v20  ;;  %1327 = vmatpush.msrb.mxu2 %v656_v7 }
 0x2ad   :  { %1328 = vmatmul.f32.vlgmr.msrb.gmra.mxu2 %v1580_v36  ;;  %1204 = vmatpush.msrb.mxu3 %v452_v8  ;;  %v439_v36 = vld [vmem:[#allocation4 + $0x688] sm:$0xff] }
 0x2ae   :  { %1281 = vmatpush.msrb.mxu0 %v474_v9  ;;  %v849_v35 = vpop.f32.mrf.mxu0  ;;  %v929_v46 = vpop.f32.mrf.mxu1 }
 0x2af   :  { %1205 = vmatpush.msrb.mxu3 %v445_v10  ;;  %v909_v49 = vpop.f32.mrf.mxu2  ;;  %v850_v2 = vadd.f32 %v849_v35, %v830_v61 }
 0x2b0   :  { %1282 = vmatpush.msrb.mxu0 %v467_v11 }
 0x2b1   :  { %1206 = vmatpush.msrb.mxu3 %v438_v12 }
 0x2b2   :  { %1283 = vmatpush.msrb.mxu0 %v460_v0 }
 0x2b3   :  { %1207 = vmatpush.msrb.mxu3 %v431_v14 }
 0x2b4   :  { %1284 = vmatpush.msrb.mxu0 %v453_v15  ;;  %1208 = vmatmul.f32.vlgmr.msrb.gmra.mxu3 %v1572_v13 }
 0x2b5   :  { %1292 = vmatpush.msra.mxu3 %v649_v16 }
 0x2b6   :  { %1285 = vmatpush.msrb.mxu0 %v446_v17 }
 0x2b7   :  { %1293 = vmatpush.msra.mxu3 %v642_v18 }
 0x2b8   :  { %1286 = vmatpush.msrb.mxu0 %v439_v36 }
 0x2b9   :  { %1294 = vmatpush.msra.mxu3 %v635_v21 }
 0x2ba   :  { %1287 = vmatpush.msrb.mxu0 %v432_v19 }
 0x2bb   :  { %1288 = vmatmul.f32.vlgmr.msrb.gmra.mxu0 %v1572_v13  ;;  %1295 = vmatpush.msra.mxu3 %v628_v22  ;;  %v551_v13 = vld [vmem:[#allocation4 + $0xa08] sm:$0xff] }
 0x2bd   :  { %1296 = vmatpush.msra.mxu3 %v621_v24 }
 0x2bf   :  { %1297 = vmatpush.msra.mxu3 %v614_v25 }
 0x2c1   :  { %1298 = vmatpush.msra.mxu3 %v607_v26 }
 0x2c3   :  { %1299 = vmatpush.msra.mxu3 %v600_v27 }
 0x2c5   :  { %1300 = vmatpush.msra.mxu3 %v593_v28 }
 0x2c6   :  { %v1009_v57 = vpop.f32.mrf.mxu2 }
 0x2c7   :  { %1301 = vmatpush.msra.mxu3 %v586_v29 }
 0x2c9   :  { %1302 = vmatpush.msra.mxu3 %v579_v30  ;;  %v949_v42 = vpop.f32.mrf.mxu0 }
 0x2ca   :  { %v1029_v53 = vpop.f32.mrf.mxu1 }
 0x2cb   :  { %1303 = vmatpush.msra.mxu3 %v572_v31 }
 0x2cd   :  { %1304 = vmatpush.msra.mxu3 %v565_v32 }
 0x2ce   :  { %v869_v37 = vpop.f32.mrf.mxu3 }
 0x2cf   :  { %1305 = vmatpush.msra.mxu3 %v558_v33  ;;  %v870_v5 = vadd.f32 %v869_v37, %v850_v2 }
 0x2d1   :  { %1306 = vmatpush.msra.mxu3 %v551_v13  ;;  %v1352_v9 = vmul.f32 0.5, %v870_v5  ;;  %v1109_v11 = vpop.f32.mrf.mxu2 }
 0x2d3   :  { %1307 = vmatpush.msra.mxu3 %v544_v34  ;;  %v969_v50 = vpop.f32.mrf.mxu0  ;;  %v779_v34 = vperm.slane %v1617_v43, 5 }
 0x2d4   :  { %1308 = vmatmul.f32.vlgmr.msra.gmra.mxu3 %v1575_v23  ;;  %v970_v23 = vadd.f32 %v969_v50, %v776_v47  ;;  %v1049_v1 = vpop.f32.mrf.mxu1  ;;  %v780_v50 = vperm.slane %v1617_v43, 6 }
 0x2d5   :  { %v1050_v6 = vadd.f32 %v1049_v1, %v777_v62 }
 0x2d9   :  { %v889_v44 = vpop.f32.mrf.mxu3 }
 0x2da   :  { %v890_v48 = vadd.f32 %v889_v44, %v775_v45  ;;  %v778_v44 = vperm.slane %v1617_v43, 4 }
 0x2dc   :  { %v910_v52 = vadd.f32 %v909_v49, %v890_v48 }
 0x2de   :  { %v930_v56 = vadd.f32 %v929_v46, %v910_v52 }
 0x2e0   :  { %v950_v60 = vadd.f32 %v949_v42, %v930_v56 }
 0x2e2   :  { %v1353_v3 = vmul.f32 0.5, %v950_v60 }
 0x2e4   :  { %1430 = vtanh.f32 %v1353_v3 }
 0x2ea   :  { %v1431_v0 = vpop.eup %1430 }
 0x2eb   :  { %v1367_v16 = vadd.f32 1.0, %v1431_v0  ;;  %v1129_v13 = vpop.f32.mrf.mxu2 }
 0x2ec   :  { %v1130_v47 = vadd.f32 %v1129_v13, %v778_v44 }
 0x2ed   :  { %v1374_v36 = vmul.f32 0.5, %v1367_v16 }
 0x2ef   :  { %v1387_v25 = vrot.slane %v1374_v36, 6 }
 0x2f3   :  { %v989_v51 = vpop.f32.mrf.mxu3  ;;  %v1069_v4 = vpop.f32.mrf.mxu0 }
 0x2f4   :  { %v990_v55 = vadd.f32 %v989_v51, %v970_v23  ;;  %v1070_v7 = vadd.f32 %v1069_v4, %v1050_v6  ;;  %v1149_v38 = vpop.f32.mrf.mxu1 }
 0x2f5   :  { %v1150_v49 = vadd.f32 %v1149_v38, %v1130_v47 }
 0x2f6   :  { %v1010_v59 = vadd.f32 %v1009_v57, %v990_v55 }
 0x2f8   :  { %v1030_v63 = vadd.f32 %v1029_v53, %v1010_v59 }
 0x2fa   :  { %v1354_v20 = vmul.f32 0.5, %v1030_v63 }
 0x2fc   :  { %1432 = vtanh.f32 %v1354_v20 }
 0x2fd   :  { %1434 = vtanh.f32 %v1352_v9 }
 0x302   :  { %v1433_v15 = vpop.eup %1432 }
 0x303   :  { %v1368_v17 = vadd.f32 1.0, %v1433_v15  ;;  %v1435_v18 = vpop.eup %1434 }
 0x304   :  { %v1366_v19 = vadd.f32 1.0, %v1435_v18 }
 0x305   :  { %v1375_v22 = vmul.f32 0.5, %v1368_v17 }
 0x306   :  { %v1373_v27 = vmul.f32 0.5, %v1366_v19 }
 0x307   :  { %v1388_v28 = vrot.slane %v1375_v22, 4 }
 0x308   :  { %v1393_v30 = vsel %vm1392_vm3, %v1373_v27, %v1387_v25 }
 0x30d   :  { %v1229_v40 = vpop.f32.mrf.mxu2 }
 0x315   :  { %v1089_v8 = vpop.f32.mrf.mxu3  ;;  %v1169_v37 = vpop.f32.mrf.mxu0 }
 0x316   :  { %v1090_v10 = vadd.f32 %v1089_v8, %v1070_v7  ;;  %v1249_v42 = vpop.f32.mrf.mxu1  ;;  %v1170_v51 = vadd.f32 %v1169_v37, %v1150_v49 }
 0x318   :  { %v1110_v12 = vadd.f32 %v1109_v11, %v1090_v10 }
 0x31a   :  { %v1355_v14 = vmul.f32 0.5, %v1110_v12 }
 0x31c   :  { %1436 = vtanh.f32 %v1355_v14 }
 0x31f   :  { %v1189_v33 = vpop.f32.mrf.mxu3  ;;  %v1349_v60 = vpop.f32.mrf.mxu1 }
 0x320   :  { %v1269_v45 = vpop.f32.mrf.mxu0  ;;  %v1190_v53 = vadd.f32 %v1189_v33, %v1170_v51 }
 0x322   :  { %v1437_v21 = vpop.eup %1436  ;;  %v1356_v57 = vmul.f32 0.5, %v1190_v53 }
 0x323   :  { %v1369_v24 = vadd.f32 1.0, %v1437_v21 }
 0x325   :  { %v1376_v26 = vmul.f32 0.5, %v1369_v24 }
 0x327   :  { %v1389_v29 = vrot.slane %v1376_v26, 2 }
 0x329   :  { %v1395_v31 = vsel %vm1394_vm4, %v1388_v28, %v1389_v29 }
 0x32a   :  { %v1397_v32 = vsel %vm1396_vm5, %v1393_v30, %v1395_v31 }
 0x32b   :  { %1402 = vst [vmem:[%s1639_s3] sm:$0xff] %v1397_v32 }
 0x330   :  { %v1329_v58 = vpop.f32.mrf.mxu2 }
 0x337   :  { %v1209_v35 = vpop.f32.mrf.mxu3 }
 0x338   :  { %v1210_v39 = vadd.f32 %v1209_v35, %v779_v34  ;;  %v1289_v52 = vpop.f32.mrf.mxu0 }
 0x339   :  { %v1290_v54 = vadd.f32 %v1289_v52, %v780_v50 }
 0x33a   :  { %v1230_v41 = vadd.f32 %v1229_v40, %v1210_v39 }
 0x33c   :  { %v1250_v46 = vadd.f32 %v1249_v42, %v1230_v41 }
 0x33e   :  { %v1270_v48 = vadd.f32 %v1269_v45, %v1250_v46 }
 0x340   :  { %v1357_v23 = vmul.f32 0.5, %v1270_v48 }
 0x342   :  { %1438 = vtanh.f32 %v1357_v23 }
 0x343   :  { %1440 = vtanh.f32 %v1356_v57 }
 0x348   :  { %v1439_v62 = vpop.eup %1438 }
 0x349   :  { %v1371_v1 = vadd.f32 1.0, %v1439_v62  ;;  %v1441_v2 = vpop.eup %1440 }
 0x34a   :  { %v1370_v4 = vadd.f32 1.0, %v1441_v2 }
 0x34b   :  { %v1378_v43 = vmul.f32 0.5, %v1371_v1 }
 0x34c   :  { %v1377_v7 = vmul.f32 0.5, %v1370_v4 }
 0x34d   :  { %v1390_v6 = vrot.slane %v1378_v43, 6 }
 0x34f   :  { %v1398_v9 = vsel %vm1392_vm3, %v1377_v7, %v1390_v6 }
 0x357   :  { %v1309_v55 = vpop.f32.mrf.mxu3 }
 0x358   :  { %v1310_v56 = vadd.f32 %v1309_v55, %v1290_v54 }
 0x35a   :  { %v1330_v59 = vadd.f32 %v1329_v58, %v1310_v56 }
 0x35c   :  { %v1350_v61 = vadd.f32 %v1349_v60, %v1330_v59 }
 0x35e   :  { %v1358_v63 = vmul.f32 0.5, %v1350_v61 }
 0x360   :  { %1442 = vtanh.f32 %v1358_v63 }
 0x366   :  { %v1443_v3 = vpop.eup %1442 }
 0x367   :  { %v1372_v5 = vadd.f32 1.0, %v1443_v3 }
 0x369   :  { %v1379_v20 = vmul.f32 0.5, %v1372_v5 }
 0x36b   :  { %v1391_v8 = vrot.slane %v1379_v20, 4 }
 0x36d   :  { %v1399_v10 = vsel %vm1396_vm5, %v1398_v9, %v1391_v8 }
 0x36e   :  { %1403 = vst [vmem:[%s1639_s3 + $0x8] sm:$0x3f] %v1399_v10 }
 0x36f   :  { %1408 = vsyncpa [#allocation3], 1 }
 0x370   :  { %1409 = vsyncpa [#allocation5], 1 }

</bundles_post_ra>
